<compile_context>
chip_gen: v6e
topology: v6e:2x2x1
jax: 0.10.0
libtpu: 0.0.40
codegen_flags: <defaults>
</compile_context>

<pallas_src>
import functools

import jax
import jax.numpy as jnp
import numpy as np
from jax.experimental import pallas as pl
from jax.experimental.pallas import tpu as pltpu

MEL = 29    # BatchNorm1d channels
COND = 8    # condition width (37 conv-in channels - 29 mel)
T = 16      # conv-stack input width (fc1 expects 64 conv features + 8 cond)
XPAD = 512  # lane-dense padding of the flattened T*MEL = 464 speech row


def _round_up(x, m):
    return -(-x // m) * m


def _pick_b_tile(batch):
    """Sublane-dense batch tile: >=2 grid steps (both v7x TCs) for batch > 8,
    <= 512 rows per tile, and at most a few padded rows."""
    b8 = _round_up(batch, 8)
    if b8 <= 8:
        return 8
    return min(_round_up(b8 // 2, 8), 512)


# ----------------------------------------------------------------------------
# Kernel 1: gridded BatchNorm1d(29) statistics -> fused scale / shift (1, 29).
# Zero-padded rows contribute nothing to sum / sum-of-squares; only the true
# row count `n_rows` enters the mean / variance.
# ----------------------------------------------------------------------------
def bn_stats_kernel(x_ref, gamma_ref, beta_ref, scale_ref, shift_ref,
                    sum_ref, sq_ref, *, n_rows, eps):
    step = pl.program_id(0)

    @pl.when(step == 0)
    def _():
        sum_ref[...] = jnp.zeros_like(sum_ref)
        sq_ref[...] = jnp.zeros_like(sq_ref)

    x = x_ref[...]                                       # (R_TILE, 29) f32
    sum_ref[...] += jnp.sum(x, axis=0, keepdims=True)
    sq_ref[...] += jnp.sum(x * x, axis=0, keepdims=True)

    @pl.when(step == pl.num_programs(0) - 1)
    def _():
        inv_n = 1.0 / n_rows
        mean = sum_ref[...] * inv_n
        var = sq_ref[...] * inv_n - mean * mean
        inv = jax.lax.rsqrt(var + eps)
        scale = gamma_ref[...] * inv
        shift = beta_ref[...] - mean * scale
        scale_ref[...] = scale
        shift_ref[...] = shift


# ----------------------------------------------------------------------------
# Kernel 2: the whole encoder on one batch tile — 7 dense bf16 MXU matmuls
# (f32 accumulation), no reshapes / concats / per-position slicing inside.
# ----------------------------------------------------------------------------
def speech_encoder_kernel(
    x_ref,       # (Bt, 512) bf16: raw speech, time-major / channel-minor, 0-pad
    cond_ref,    # (Bt, 8)   bf16
    w1_ref,      # (512, 256) bf16: conv1-as-matmul, BN scale folded into rows
    b1_ref,      # (1, 256)   f32 : conv1 bias + BN-shift contribution
    wc_ref,      # (8, 384)   bf16: merged condition weights [conv1 | fc1]
    w2_ref, b2_ref,            # conv2 as matmul
    w3_ref, b3_ref,            # conv3 as matmul
    w4_ref, b4_ref,            # conv4 as matmul
    f1s_ref, f1b_ref,          # fc1 (conv-feature part) + bias
    f2w_ref, f2b_ref,          # fc2 (lane-padded output)
    out_ref,                   # (Bt, out_pad) f32
):
    f32 = jnp.float32
    bf16 = jnp.bfloat16
    nc1 = b1_ref.shape[1]                                # 256 (128-aligned)

    # single K=8 condition matmul; split is a free 128-aligned lane slice
    condc = jnp.dot(cond_ref[...], wc_ref[...], preferred_element_type=f32)

    # conv1 + ReLU (BatchNorm already folded into w1 / b1)
    h = (jnp.dot(x_ref[...], w1_ref[...], preferred_element_type=f32)
         + condc[:, :nc1] + b1_ref[...])
    h = jnp.maximum(h, 0.0).astype(bf16)
    # conv2..conv4 + ReLU (elementwise math in f32, MXU operands in bf16)
    h = jnp.maximum(jnp.dot(h, w2_ref[...], preferred_element_type=f32)
                    + b2_ref[...], 0.0).astype(bf16)
    h = jnp.maximum(jnp.dot(h, w3_ref[...], preferred_element_type=f32)
                    + b3_ref[...], 0.0).astype(bf16)
    h = jnp.maximum(jnp.dot(h, w4_ref[...], preferred_element_type=f32)
                    + b4_ref[...], 0.0).astype(bf16)
    # fc1 + tanh (condition contribution comes from the merged matmul)
    g = jnp.tanh(jnp.dot(h, f1s_ref[...], preferred_element_type=f32)
                 + condc[:, nc1:] + f1b_ref[...]).astype(bf16)
    # fc2 (lane-dense padded output)
    y = jnp.dot(g, f2w_ref[...], preferred_element_type=f32) + f2b_ref[...]
    out_ref[...] = y.astype(out_ref.dtype)


# ----------------------------------------------------------------------------
# One-time host-side (numpy) parameter re-layout — runs OUTSIDE jit.
# ----------------------------------------------------------------------------
def _conv_as_block_matrix(w, width):
    """torch conv weight (Cout, Cin, 1, 3), circular pad 1 / stride 2 along W
    -> dense (width, Cin, width//2, Cout) block matrix (weight-only relayout)."""
    w = np.asarray(w, np.float32)
    c_in, c_out = w.shape[1], w.shape[0]
    w_out = width // 2
    m = np.zeros((width, c_in, w_out, c_out), np.float32)
    for t in range(3):
        kt = w[:, :, 0, t].T                               # (Cin, Cout)
        for wo in range(w_out):
            wi = (2 * wo - 1 + t) % width
            m[wi, :, wo, :] += kt
    return m


def prepare_params(params):
    """Build the dense matmul operands the kernel consumes (called once)."""
    f32, bf16 = np.float32, jnp.bfloat16

    m1 = _conv_as_block_matrix(params["conv1_w"], T)           # (16,37,8,32)
    c1 = m1.shape[3]
    w1s = m1[:, :MEL].reshape(T * MEL, (T // 2) * c1)          # (464, 256)
    w1s = np.pad(w1s, ((0, XPAD - T * MEL), (0, 0)))           # (512, 256)
    w1c = m1[:, MEL:].sum(axis=0).reshape(COND, (T // 2) * c1)  # (8, 256)
    b1 = np.tile(np.asarray(params["conv1_b"], f32), T // 2)[None, :]

    def full_mat(wk, bk, width):
        m = _conv_as_block_matrix(wk, width)
        wm = m.reshape(width * m.shape[1], (width // 2) * m.shape[3])
        bt = np.tile(np.asarray(bk, f32), width // 2)[None, :]
        return wm, bt

    w2, b2 = full_mat(params["conv2_w"], params["conv2_b"], T // 2)
    w3, b3 = full_mat(params["conv3_w"], params["conv3_b"], T // 4)
    w4, b4 = full_mat(params["conv4_w"], params["conv4_b"], T // 8)

    conv_feat = np.asarray(params["conv4_w"]).shape[0]          # 64
    fc1_wT = np.asarray(params["fc1_w"], f32).T                 # (72, 128)
    f1s, f1c = fc1_wT[:conv_feat], fc1_wT[conv_feat:]
    wc = np.concatenate([w1c, f1c], axis=1)                     # (8, 384)
    f1b = np.asarray(params["fc1_b"], f32)[None, :]

    expr = np.asarray(params["fc2_w"]).shape[0]
    out_pad = _round_up(expr, 128)                              # lane-dense out
    f2w = np.pad(np.asarray(params["fc2_w"], f32).T,
                 ((0, 0), (0, out_pad - expr)))
    f2b = np.pad(np.asarray(params["fc2_b"], f32),
                 (0, out_pad - expr))[None, :]

    return {
        "w1s": jnp.asarray(w1s),                     # f32, BN-folded per call
        "b1": jnp.asarray(b1),
        "wc": jnp.asarray(wc, dtype=bf16),
        "w2": jnp.asarray(w2, dtype=bf16), "b2": jnp.asarray(b2),
        "w3": jnp.asarray(w3, dtype=bf16), "b3": jnp.asarray(b3),
        "w4": jnp.asarray(w4, dtype=bf16), "b4": jnp.asarray(b4),
        "f1s": jnp.asarray(f1s, dtype=bf16), "f1b": jnp.asarray(f1b),
        "f2w": jnp.asarray(f2w, dtype=bf16), "f2b": jnp.asarray(f2b),
        "bn_gamma": jnp.asarray(np.asarray(params["bn_gamma"], f32))[None, :],
        "bn_beta": jnp.asarray(np.asarray(params["bn_beta"], f32))[None, :],
    }


# ----------------------------------------------------------------------------
# Forward: two pallas_calls + the tiny data-dependent BN -> conv1 fold.
# ----------------------------------------------------------------------------
@functools.partial(jax.jit, static_argnames=("expr_dim",))
def speech_encoder_forward(speech, condition, w, expr_dim):
    f32, bf16 = jnp.float32, jnp.bfloat16
    B = speech.shape[0]
    assert speech.shape[1] == T and speech.shape[2] == MEL
    out_pad = w["f2w"].shape[1]

    # ---- pass 1: gridded BatchNorm statistics (f32) -------------------------
    x2d = speech.astype(f32).reshape(B * T, MEL)
    rows = B * T
    r_tile = min(1024, rows)                      # rows is a multiple of 16
    rows_p = _round_up(rows, r_tile)
    if rows_p != rows:
        x2d = jnp.pad(x2d, ((0, rows_p - rows), (0, 0)))
    scale29, shift29 = pl.pallas_call(
        functools.partial(bn_stats_kernel, n_rows=rows, eps=1e-5),
        out_shape=(jax.ShapeDtypeStruct((1, MEL), f32),
                   jax.ShapeDtypeStruct((1, MEL), f32)),
        grid=(rows_p // r_tile,),
        in_specs=[pl.BlockSpec((r_tile, MEL), lambda i: (i, 0)),
                  pl.BlockSpec((1, MEL), lambda i: (0, 0)),
                  pl.BlockSpec((1, MEL), lambda i: (0, 0))],
        out_specs=(pl.BlockSpec((1, MEL), lambda i: (0, 0)),
                   pl.BlockSpec((1, MEL), lambda i: (0, 0))),
        scratch_shapes=[pltpu.VMEM((1, MEL), f32),
                        pltpu.VMEM((1, MEL), f32)],
        compiler_params=pltpu.CompilerParams(
            dimension_semantics=("arbitrary",)),
    )(x2d, w["bn_gamma"], w["bn_beta"])

    # ---- fold BN scale/shift into conv1 (tiny, data-dependent) --------------
    scale_row = jnp.pad(jnp.tile(scale29[0], T), (0, XPAD - T * MEL))
    shift_row = jnp.pad(jnp.tile(shift29[0], T), (0, XPAD - T * MEL))
    w1 = (w["w1s"] * scale_row[:, None]).astype(bf16)            # (512, 256)
    b1 = w["b1"] + jnp.dot(shift_row[None, :], w["w1s"],
                           precision=jax.lax.Precision.HIGHEST)  # (1, 256) f32

    # ---- pass 2: batch-tiled encoder (bf16 MXU operands) --------------------
    x_bf = jnp.pad(speech.astype(f32).reshape(B, T * MEL),
                   ((0, 0), (0, XPAD - T * MEL))).astype(bf16)
    cond_bf = condition.astype(bf16)

    b_tile = _pick_b_tile(B)
    bp = _round_up(B, b_tile)
    if bp != B:
        x_bf = jnp.pad(x_bf, ((0, bp - B), (0, 0)))
        cond_bf = jnp.pad(cond_bf, ((0, bp - B), (0, 0)))

    args = (x_bf, cond_bf, w1, b1, w["wc"], w["w2"], w["b2"], w["w3"],
            w["b3"], w["w4"], w["b4"], w["f1s"], w["f1b"], w["f2w"], w["f2b"])

    def batch_spec(ncols):
        return pl.BlockSpec((b_tile, ncols), lambda i: (i, 0))

    def resident(a):
        # TODO(synk): pipeline_mode=pl.Buffered(1) would drop the pointless
        # double buffers on these never-changing weight blocks; left at the
        # default for lowering safety (total weight VMEM is < 1 MiB anyway).
        return pl.BlockSpec(a.shape, lambda i: (0, 0))

    in_specs = [batch_spec(XPAD), batch_spec(COND)]
    in_specs += [resident(a) for a in args[2:]]

    out = pl.pallas_call(
        speech_encoder_kernel,
        out_shape=jax.ShapeDtypeStruct((bp, out_pad), f32),
        grid=(bp // b_tile,),
        in_specs=in_specs,
        out_specs=pl.BlockSpec((b_tile, out_pad), lambda i: (i, 0)),
        compiler_params=pltpu.CompilerParams(
            dimension_semantics=("parallel",)),
    )(*args)
    return out[:B, :expr_dim]


# ----------------------------------------------------------------------------
# Pure-JAX f32 reference (correctness check only).
# ----------------------------------------------------------------------------
def reference_forward(speech, condition, p):
    hi = jax.lax.Precision.HIGHEST
    B, t, _ = speech.shape
    x = speech.astype(jnp.float32)
    mean = jnp.mean(x, axis=(0, 1), keepdims=True)
    var = jnp.mean((x - mean) ** 2, axis=(0, 1), keepdims=True)
    xn = (x - mean) / jnp.sqrt(var + 1e-5) * p["bn_gamma"] + p["bn_beta"]
    condw = jnp.broadcast_to(condition[:, None, :], (B, t, condition.shape[1]))
    feat = jnp.concatenate([xn, condw], axis=-1)            # (B, 16, 37) NWC

    def conv(xin, wk, bk):
        xp = jnp.pad(xin, ((0, 0), (1, 1), (0, 0)), mode="wrap")
        k = jnp.transpose(wk[:, :, 0, :], (2, 1, 0))         # (3, Cin, Cout)
        out = jax.lax.conv_general_dilated(
            xp, k, window_strides=(2,), padding="VALID",
            dimension_numbers=("NWC", "WIO", "NWC"), precision=hi)
        return jnp.maximum(out + bk[None, None, :], 0.0)

    feat = conv(feat, p["conv1_w"], p["conv1_b"])
    feat = conv(feat, p["conv2_w"], p["conv2_b"])
    feat = conv(feat, p["conv3_w"], p["conv3_b"])
    feat = conv(feat, p["conv4_w"], p["conv4_b"])
    feat = feat[:, 0, :]                                     # (B, 64)
    feat = jnp.concatenate([feat, condition], axis=-1)       # (B, 72)
    h = jnp.tanh(jnp.dot(feat, p["fc1_w"].T, precision=hi) + p["fc1_b"])
    return jnp.dot(h, p["fc2_w"].T, precision=hi) + p["fc2_b"]


# ----------------------------------------------------------------------------
# Deterministic parameter init + demo run.
# ----------------------------------------------------------------------------
def init_params(key, expr_dim):
    ks = jax.random.split(key, 16)
    n = lambda k, s, scale=0.1: scale * jax.random.normal(k, s, jnp.float32)
    return {
        "bn_gamma": 1.0 + n(ks[0], (29,)),
        "bn_beta": n(ks[1], (29,)),
        "conv1_w": n(ks[2], (32, 37, 1, 3)), "conv1_b": n(ks[3], (32,)),
        "conv2_w": n(ks[4], (32, 32, 1, 3)), "conv2_b": n(ks[5], (32,)),
        "conv3_w": n(ks[6], (64, 32, 1, 3)), "conv3_b": n(ks[7], (64,)),
        "conv4_w": n(ks[8], (64, 64, 1, 3)), "conv4_b": n(ks[9], (64,)),
        "fc1_w": n(ks[10], (128, 72)), "fc1_b": n(ks[11], (128,)),
        "fc2_w": n(ks[12], (expr_dim, 128)), "fc2_b": n(ks[13], (expr_dim,)),
    }


if __name__ == "__main__":
    config = {
        "expression_dim": 64,
        "condition_speech_features": True,
        "speech_encoder_size_factor": 1.0,
    }
    key = jax.random.PRNGKey(0)
    kp, kx, kc = jax.random.split(key, 3)
    params = init_params(kp, config["expression_dim"])
    prepared = prepare_params(params)      # one-time host-side weight relayout

    # speech_feature: (B, T=16, 29) (module permutes to (B, 29, T) for BN);
    # condition: (B, 8) so conv input channels = 29 + 8 = 37.
    speech = jax.random.normal(kx, (2, 16, 29), jnp.float32)
    condition = jax.random.normal(kc, (2, 8), jnp.float32)

    out = jax.block_until_ready(
        speech_encoder_forward(speech, condition, prepared,
                               expr_dim=config["expression_dim"]))
    ref = jax.block_until_ready(reference_forward(speech, condition, params))

    assert out.shape == (2, config["expression_dim"])
    # bf16 MXU operands (f32 accumulation) vs an all-f32 reference: tolerance
    # reflects bf16 operand rounding through the 7-matmul chain.
    if not np.allclose(np.asarray(out), np.asarray(ref), rtol=5e-2, atol=1e-1):
        raise AssertionError("Pallas kernel does not match reference")
    print("KERNEL_OK")
</pallas_src>

<mosaic_0001>
module attributes {stable_mosaic.version = 11 : i64} {
  func.func @bn_stats_kernel(%arg0: i32, %arg1: memref<32x29xf32, #tpu.memory_space<vmem>>, %arg2: memref<1x29xf32, #tpu.memory_space<vmem>>, %arg3: memref<1x29xf32, #tpu.memory_space<vmem>>, %arg4: memref<1x29xf32, #tpu.memory_space<vmem>>, %arg5: memref<1x29xf32, #tpu.memory_space<vmem>>, %arg6: memref<1x29xf32, #tpu.memory_space<vmem>>, %arg7: memref<1x29xf32, #tpu.memory_space<vmem>>) attributes {dimension_semantics = [#tpu.dimension_semantics<arbitrary>], iteration_bounds = array<i64: 1>, scalar_prefetch = 0 : i64, scratch_operands = 2 : i64, tpu.core_type = #tpu.core_type<tc>, window_params = [{transform_indices = @transform_0, window_bounds = array<i64: 32, 29>}, {pipeline_mode = #tpu.pipeline_mode<synchronous>, transform_indices = @transform_1, window_bounds = array<i64: 1, 29>}, {pipeline_mode = #tpu.pipeline_mode<synchronous>, transform_indices = @transform_2, window_bounds = array<i64: 1, 29>}, {pipeline_mode = #tpu.pipeline_mode<synchronous>, transform_indices = @transform_3, window_bounds = array<i64: 1, 29>}, {pipeline_mode = #tpu.pipeline_mode<synchronous>, transform_indices = @transform_4, window_bounds = array<i64: 1, 29>}]} {
    %c0_i32 = arith.constant 0 : i32
    %0 = arith.cmpi eq, %arg0, %c0_i32 : i32
    %1 = arith.extui %0 : i1 to i32
    %c0_i32_0 = arith.constant 0 : i32
    %2 = arith.cmpi ne, %1, %c0_i32_0 : i32
    scf.if %2 {
      %cst_13 = arith.constant 0.000000e+00 : f32
      %18 = vector.broadcast %cst_13 : f32 to vector<1x29xf32>
      %c0_14 = arith.constant 0 : index
      %c0_15 = arith.constant 0 : index
      %19 = vector.load %arg6[%c0_14, %c0_15] : memref<1x29xf32, #tpu.memory_space<vmem>>, vector<1x29xf32>
      tpu.vector_store %arg6[%c0_14, %c0_15], %18 {strides = array<i32>} : memref<1x29xf32, #tpu.memory_space<vmem>>, vector<1x29xf32>,
      %cst_16 = arith.constant 0.000000e+00 : f32
      %20 = vector.broadcast %cst_16 : f32 to vector<1x29xf32>
      %c0_17 = arith.constant 0 : index
      %c0_18 = arith.constant 0 : index
      %21 = vector.load %arg7[%c0_17, %c0_18] : memref<1x29xf32, #tpu.memory_space<vmem>>, vector<1x29xf32>
      tpu.vector_store %arg7[%c0_17, %c0_18], %20 {strides = array<i32>} : memref<1x29xf32, #tpu.memory_space<vmem>>, vector<1x29xf32>,
    } else {
    }
    %c0 = arith.constant 0 : index
    %c0_1 = arith.constant 0 : index
    %3 = vector.load %arg1[%c0, %c0_1] : memref<32x29xf32, #tpu.memory_space<vmem>>, vector<32x29xf32>
    %c0_2 = arith.constant 0 : index
    %c0_3 = arith.constant 0 : index
    %4 = vector.load %arg6[%c0_2, %c0_3] : memref<1x29xf32, #tpu.memory_space<vmem>>, vector<1x29xf32>
    %cst = arith.constant dense<0.000000e+00> : vector<29xf32>
    %5 = vector.multi_reduction <add>, %3, %cst [0] : vector<32x29xf32> to vector<29xf32>
    %6 = vector.shape_cast %5 : vector<29xf32> to vector<1x29xf32>
    %7 = arith.addf %4, %6 : vector<1x29xf32>
    %c0_4 = arith.constant 0 : index
    %c0_5 = arith.constant 0 : index
    %8 = vector.load %arg6[%c0_4, %c0_5] : memref<1x29xf32, #tpu.memory_space<vmem>>, vector<1x29xf32>
    tpu.vector_store %arg6[%c0_4, %c0_5], %7 {strides = array<i32>} : memref<1x29xf32, #tpu.memory_space<vmem>>, vector<1x29xf32>,
    %c0_6 = arith.constant 0 : index
    %c0_7 = arith.constant 0 : index
    %9 = vector.load %arg7[%c0_6, %c0_7] : memref<1x29xf32, #tpu.memory_space<vmem>>, vector<1x29xf32>
    %10 = arith.mulf %3, %3 : vector<32x29xf32>
    %cst_8 = arith.constant dense<0.000000e+00> : vector<29xf32>
    %11 = vector.multi_reduction <add>, %10, %cst_8 [0] : vector<32x29xf32> to vector<29xf32>
    %12 = vector.shape_cast %11 : vector<29xf32> to vector<1x29xf32>
    %13 = arith.addf %9, %12 : vector<1x29xf32>
    %c0_9 = arith.constant 0 : index
    %c0_10 = arith.constant 0 : index
    %14 = vector.load %arg7[%c0_9, %c0_10] : memref<1x29xf32, #tpu.memory_space<vmem>>, vector<1x29xf32>
    tpu.vector_store %arg7[%c0_9, %c0_10], %13 {strides = array<i32>} : memref<1x29xf32, #tpu.memory_space<vmem>>, vector<1x29xf32>,
    %c0_i32_11 = arith.constant 0 : i32
    %15 = arith.cmpi eq, %arg0, %c0_i32_11 : i32
    %16 = arith.extui %15 : i1 to i32
    %c0_i32_12 = arith.constant 0 : i32
    %17 = arith.cmpi ne, %16, %c0_i32_12 : i32
    scf.if %17 {
      %c0_13 = arith.constant 0 : index
      %c0_14 = arith.constant 0 : index
      %18 = vector.load %arg6[%c0_13, %c0_14] : memref<1x29xf32, #tpu.memory_space<vmem>>, vector<1x29xf32>
      %cst_15 = arith.constant 3.125000e-02 : f32
      %19 = vector.broadcast %cst_15 : f32 to vector<1x29xf32>
      %20 = arith.mulf %18, %19 : vector<1x29xf32>
      %c0_16 = arith.constant 0 : index
      %c0_17 = arith.constant 0 : index
      %21 = vector.load %arg7[%c0_16, %c0_17] : memref<1x29xf32, #tpu.memory_space<vmem>>, vector<1x29xf32>
      %cst_18 = arith.constant 3.125000e-02 : f32
      %22 = vector.broadcast %cst_18 : f32 to vector<1x29xf32>
      %23 = arith.mulf %21, %22 : vector<1x29xf32>
      %24 = arith.mulf %20, %20 : vector<1x29xf32>
      %25 = arith.subf %23, %24 : vector<1x29xf32>
      %cst_19 = arith.constant 9.99999974E-6 : f32
      %26 = vector.broadcast %cst_19 : f32 to vector<1x29xf32>
      %27 = arith.addf %25, %26 : vector<1x29xf32>
      %28 = math.rsqrt %27 : vector<1x29xf32>
      %c0_20 = arith.constant 0 : index
      %c0_21 = arith.constant 0 : index
      %29 = vector.load %arg2[%c0_20, %c0_21] : memref<1x29xf32, #tpu.memory_space<vmem>>, vector<1x29xf32>
      %30 = arith.mulf %29, %28 : vector<1x29xf32>
      %c0_22 = arith.constant 0 : index
      %c0_23 = arith.constant 0 : index
      %31 = vector.load %arg3[%c0_22, %c0_23] : memref<1x29xf32, #tpu.memory_space<vmem>>, vector<1x29xf32>
      %32 = arith.mulf %20, %30 : vector<1x29xf32>
      %33 = arith.subf %31, %32 : vector<1x29xf32>
      %c0_24 = arith.constant 0 : index
      %c0_25 = arith.constant 0 : index
      %34 = vector.load %arg4[%c0_24, %c0_25] : memref<1x29xf32, #tpu.memory_space<vmem>>, vector<1x29xf32>
      tpu.vector_store %arg4[%c0_24, %c0_25], %30 {strides = array<i32>} : memref<1x29xf32, #tpu.memory_space<vmem>>, vector<1x29xf32>,
      %c0_26 = arith.constant 0 : index
      %c0_27 = arith.constant 0 : index
      %35 = vector.load %arg5[%c0_26, %c0_27] : memref<1x29xf32, #tpu.memory_space<vmem>>, vector<1x29xf32>
      tpu.vector_store %arg5[%c0_26, %c0_27], %33 {strides = array<i32>} : memref<1x29xf32, #tpu.memory_space<vmem>>, vector<1x29xf32>,
    } else {
    }
    return
  }
  func.func @transform_0(%arg0: i32) -> (i32, i32) {
    %c0_i32 = arith.constant 0 : i32
    %c0_i32_0 = arith.constant 0 : i32
    return %arg0, %c0_i32 : i32, i32
  }
  func.func @transform_1(%arg0: i32) -> (i32, i32) {
    %c0_i32 = arith.constant 0 : i32
    %c0_i32_0 = arith.constant 0 : i32
    %c0_i32_1 = arith.constant 0 : i32
    return %c0_i32, %c0_i32_0 : i32, i32
  }
  func.func @transform_2(%arg0: i32) -> (i32, i32) {
    %c0_i32 = arith.constant 0 : i32
    %c0_i32_0 = arith.constant 0 : i32
    %c0_i32_1 = arith.constant 0 : i32
    return %c0_i32, %c0_i32_0 : i32, i32
  }
  func.func @transform_3(%arg0: i32) -> (i32, i32) {
    %c0_i32 = arith.constant 0 : i32
    %c0_i32_0 = arith.constant 0 : i32
    %c0_i32_1 = arith.constant 0 : i32
    return %c0_i32, %c0_i32_0 : i32, i32
  }
  func.func @transform_4(%arg0: i32) -> (i32, i32) {
    %c0_i32 = arith.constant 0 : i32
    %c0_i32_0 = arith.constant 0 : i32
    %c0_i32_1 = arith.constant 0 : i32
    return %c0_i32, %c0_i32_0 : i32, i32
  }
}

module attributes {stable_mosaic.version = 11 : i64} {
  func.func @speech_encoder_kernel(%arg0: i32, %arg1: memref<8x512xbf16, #tpu.memory_space<vmem>>, %arg2: memref<8x8xbf16, #tpu.memory_space<vmem>>, %arg3: memref<512x256xbf16, #tpu.memory_space<vmem>>, %arg4: memref<1x256xf32, #tpu.memory_space<vmem>>, %arg5: memref<8x384xbf16, #tpu.memory_space<vmem>>, %arg6: memref<256x128xbf16, #tpu.memory_space<vmem>>, %arg7: memref<1x128xf32, #tpu.memory_space<vmem>>, %arg8: memref<128x128xbf16, #tpu.memory_space<vmem>>, %arg9: memref<1x128xf32, #tpu.memory_space<vmem>>, %arg10: memref<128x64xbf16, #tpu.memory_space<vmem>>, %arg11: memref<1x64xf32, #tpu.memory_space<vmem>>, %arg12: memref<64x128xbf16, #tpu.memory_space<vmem>>, %arg13: memref<1x128xf32, #tpu.memory_space<vmem>>, %arg14: memref<128x128xbf16, #tpu.memory_space<vmem>>, %arg15: memref<1x128xf32, #tpu.memory_space<vmem>>, %arg16: memref<8x128xf32, #tpu.memory_space<vmem>>) attributes {dimension_semantics = [#tpu.dimension_semantics<parallel>], iteration_bounds = array<i64: 1>, scalar_prefetch = 0 : i64, scratch_operands = 0 : i64, tpu.core_type = #tpu.core_type<tc>, window_params = [{transform_indices = @transform_0, window_bounds = array<i64: 8, 512>}, {transform_indices = @transform_1, window_bounds = array<i64: 8, 8>}, {pipeline_mode = #tpu.pipeline_mode<synchronous>, transform_indices = @transform_2, window_bounds = array<i64: 512, 256>}, {pipeline_mode = #tpu.pipeline_mode<synchronous>, transform_indices = @transform_3, window_bounds = array<i64: 1, 256>}, {pipeline_mode = #tpu.pipeline_mode<synchronous>, transform_indices = @transform_4, window_bounds = array<i64: 8, 384>}, {pipeline_mode = #tpu.pipeline_mode<synchronous>, transform_indices = @transform_5, window_bounds = array<i64: 256, 128>}, {pipeline_mode = #tpu.pipeline_mode<synchronous>, transform_indices = @transform_6, window_bounds = array<i64: 1, 128>}, {pipeline_mode = #tpu.pipeline_mode<synchronous>, transform_indices = @transform_7, window_bounds = array<i64: 128, 128>}, {pipeline_mode = #tpu.pipeline_mode<synchronous>, transform_indices = @transform_8, window_bounds = array<i64: 1, 128>}, {pipeline_mode = #tpu.pipeline_mode<synchronous>, transform_indices = @transform_9, window_bounds = array<i64: 128, 64>}, {pipeline_mode = #tpu.pipeline_mode<synchronous>, transform_indices = @transform_10, window_bounds = array<i64: 1, 64>}, {pipeline_mode = #tpu.pipeline_mode<synchronous>, transform_indices = @transform_11, window_bounds = array<i64: 64, 128>}, {pipeline_mode = #tpu.pipeline_mode<synchronous>, transform_indices = @transform_12, window_bounds = array<i64: 1, 128>}, {pipeline_mode = #tpu.pipeline_mode<synchronous>, transform_indices = @transform_13, window_bounds = array<i64: 128, 128>}, {pipeline_mode = #tpu.pipeline_mode<synchronous>, transform_indices = @transform_14, window_bounds = array<i64: 1, 128>}, {transform_indices = @transform_15, window_bounds = array<i64: 8, 128>}]} {
    %c0 = arith.constant 0 : index
    %c0_0 = arith.constant 0 : index
    %0 = vector.load %arg2[%c0, %c0_0] : memref<8x8xbf16, #tpu.memory_space<vmem>>, vector<8x8xbf16>
    %c0_1 = arith.constant 0 : index
    %c0_2 = arith.constant 0 : index
    %1 = vector.load %arg5[%c0_1, %c0_2] : memref<8x384xbf16, #tpu.memory_space<vmem>>, vector<8x384xbf16>
    %cst = arith.constant dense<0.000000e+00> : vector<8x384xf32>
    %2 = tpu.matmul %0, %1, %cst {dimension_numbers = #tpu.dot_dimension_numbers<[1], [0], [0], [1], [0, 0, 1, 1], [], []>} : vector<8x8xbf16>, vector<8x384xbf16>, vector<8x384xf32> -> vector<8x384xf32>
    %c0_3 = arith.constant 0 : index
    %c0_4 = arith.constant 0 : index
    %3 = vector.load %arg1[%c0_3, %c0_4] : memref<8x512xbf16, #tpu.memory_space<vmem>>, vector<8x512xbf16>
    %c0_5 = arith.constant 0 : index
    %c0_6 = arith.constant 0 : index
    %4 = vector.load %arg3[%c0_5, %c0_6] : memref<512x256xbf16, #tpu.memory_space<vmem>>, vector<512x256xbf16>
    %cst_7 = arith.constant dense<0.000000e+00> : vector<8x256xf32>
    %5 = tpu.matmul %3, %4, %cst_7 {dimension_numbers = #tpu.dot_dimension_numbers<[1], [0], [0], [1], [0, 0, 1, 1], [], []>} : vector<8x512xbf16>, vector<512x256xbf16>, vector<8x256xf32> -> vector<8x256xf32>
    %6 = vector.extract_strided_slice %2 {offsets = [0, 0], sizes = [8, 256], strides = [1, 1]} : vector<8x384xf32> to vector<8x256xf32>
    %7 = arith.addf %5, %6 : vector<8x256xf32>
    %c0_8 = arith.constant 0 : index
    %c0_9 = arith.constant 0 : index
    %8 = vector.load %arg4[%c0_8, %c0_9] : memref<1x256xf32, #tpu.memory_space<vmem>>, vector<1x256xf32>
    %9 = vector.broadcast %8 : vector<1x256xf32> to vector<8x256xf32>
    %10 = arith.addf %7, %9 : vector<8x256xf32>
    %cst_10 = arith.constant 0.000000e+00 : f32
    %11 = vector.broadcast %cst_10 : f32 to vector<8x256xf32>
    %12 = arith.maximumf %10, %11 : vector<8x256xf32>
    %13 = arith.truncf %12 : vector<8x256xf32> to vector<8x256xbf16>
    %c0_11 = arith.constant 0 : index
    %c0_12 = arith.constant 0 : index
    %14 = vector.load %arg6[%c0_11, %c0_12] : memref<256x128xbf16, #tpu.memory_space<vmem>>, vector<256x128xbf16>
    %cst_13 = arith.constant dense<0.000000e+00> : vector<8x128xf32>
    %15 = tpu.matmul %13, %14, %cst_13 {dimension_numbers = #tpu.dot_dimension_numbers<[1], [0], [0], [1], [0, 0, 1, 1], [], []>} : vector<8x256xbf16>, vector<256x128xbf16>, vector<8x128xf32> -> vector<8x128xf32>
    %c0_14 = arith.constant 0 : index
    %c0_15 = arith.constant 0 : index
    %16 = vector.load %arg7[%c0_14, %c0_15] : memref<1x128xf32, #tpu.memory_space<vmem>>, vector<1x128xf32>
    %17 = vector.broadcast %16 : vector<1x128xf32> to vector<8x128xf32>
    %18 = arith.addf %15, %17 : vector<8x128xf32>
    %cst_16 = arith.constant 0.000000e+00 : f32
    %19 = vector.broadcast %cst_16 : f32 to vector<8x128xf32>
    %20 = arith.maximumf %18, %19 : vector<8x128xf32>
    %21 = arith.truncf %20 : vector<8x128xf32> to vector<8x128xbf16>
    %c0_17 = arith.constant 0 : index
    %c0_18 = arith.constant 0 : index
    %22 = vector.load %arg8[%c0_17, %c0_18] : memref<128x128xbf16, #tpu.memory_space<vmem>>, vector<128x128xbf16>
    %cst_19 = arith.constant dense<0.000000e+00> : vector<8x128xf32>
    %23 = tpu.matmul %21, %22, %cst_19 {dimension_numbers = #tpu.dot_dimension_numbers<[1], [0], [0], [1], [0, 0, 1, 1], [], []>} : vector<8x128xbf16>, vector<128x128xbf16>, vector<8x128xf32> -> vector<8x128xf32>
    %c0_20 = arith.constant 0 : index
    %c0_21 = arith.constant 0 : index
    %24 = vector.load %arg9[%c0_20, %c0_21] : memref<1x128xf32, #tpu.memory_space<vmem>>, vector<1x128xf32>
    %25 = vector.broadcast %24 : vector<1x128xf32> to vector<8x128xf32>
    %26 = arith.addf %23, %25 : vector<8x128xf32>
    %cst_22 = arith.constant 0.000000e+00 : f32
    %27 = vector.broadcast %cst_22 : f32 to vector<8x128xf32>
    %28 = arith.maximumf %26, %27 : vector<8x128xf32>
    %29 = arith.truncf %28 : vector<8x128xf32> to vector<8x128xbf16>
    %c0_23 = arith.constant 0 : index
    %c0_24 = arith.constant 0 : index
    %30 = vector.load %arg10[%c0_23, %c0_24] : memref<128x64xbf16, #tpu.memory_space<vmem>>, vector<128x64xbf16>
    %cst_25 = arith.constant dense<0.000000e+00> : vector<8x64xf32>
    %31 = tpu.matmul %29, %30, %cst_25 {dimension_numbers = #tpu.dot_dimension_numbers<[1], [0], [0], [1], [0, 0, 1, 1], [], []>} : vector<8x128xbf16>, vector<128x64xbf16>, vector<8x64xf32> -> vector<8x64xf32>
    %c0_26 = arith.constant 0 : index
    %c0_27 = arith.constant 0 : index
    %32 = vector.load %arg11[%c0_26, %c0_27] : memref<1x64xf32, #tpu.memory_space<vmem>>, vector<1x64xf32>
    %33 = vector.broadcast %32 : vector<1x64xf32> to vector<8x64xf32>
    %34 = arith.addf %31, %33 : vector<8x64xf32>
    %cst_28 = arith.constant 0.000000e+00 : f32
    %35 = vector.broadcast %cst_28 : f32 to vector<8x64xf32>
    %36 = arith.maximumf %34, %35 : vector<8x64xf32>
    %37 = arith.truncf %36 : vector<8x64xf32> to vector<8x64xbf16>
    %c0_29 = arith.constant 0 : index
    %c0_30 = arith.constant 0 : index
    %38 = vector.load %arg12[%c0_29, %c0_30] : memref<64x128xbf16, #tpu.memory_space<vmem>>, vector<64x128xbf16>
    %cst_31 = arith.constant dense<0.000000e+00> : vector<8x128xf32>
    %39 = tpu.matmul %37, %38, %cst_31 {dimension_numbers = #tpu.dot_dimension_numbers<[1], [0], [0], [1], [0, 0, 1, 1], [], []>} : vector<8x64xbf16>, vector<64x128xbf16>, vector<8x128xf32> -> vector<8x128xf32>
    %40 = vector.extract_strided_slice %2 {offsets = [0, 256], sizes = [8, 128], strides = [1, 1]} : vector<8x384xf32> to vector<8x128xf32>
    %41 = arith.addf %39, %40 : vector<8x128xf32>
    %c0_32 = arith.constant 0 : index
    %c0_33 = arith.constant 0 : index
    %42 = vector.load %arg13[%c0_32, %c0_33] : memref<1x128xf32, #tpu.memory_space<vmem>>, vector<1x128xf32>
    %43 = vector.broadcast %42 : vector<1x128xf32> to vector<8x128xf32>
    %44 = arith.addf %41, %43 : vector<8x128xf32>
    %45 = math.tanh %44 : vector<8x128xf32>
    %46 = arith.truncf %45 : vector<8x128xf32> to vector<8x128xbf16>
    %c0_34 = arith.constant 0 : index
    %c0_35 = arith.constant 0 : index
    %47 = vector.load %arg14[%c0_34, %c0_35] : memref<128x128xbf16, #tpu.memory_space<vmem>>, vector<128x128xbf16>
    %cst_36 = arith.constant dense<0.000000e+00> : vector<8x128xf32>
    %48 = tpu.matmul %46, %47, %cst_36 {dimension_numbers = #tpu.dot_dimension_numbers<[1], [0], [0], [1], [0, 0, 1, 1], [], []>} : vector<8x128xbf16>, vector<128x128xbf16>, vector<8x128xf32> -> vector<8x128xf32>
    %c0_37 = arith.constant 0 : index
    %c0_38 = arith.constant 0 : index
    %49 = vector.load %arg15[%c0_37, %c0_38] : memref<1x128xf32, #tpu.memory_space<vmem>>, vector<1x128xf32>
    %50 = vector.broadcast %49 : vector<1x128xf32> to vector<8x128xf32>
    %51 = arith.addf %48, %50 : vector<8x128xf32>
    %c0_39 = arith.constant 0 : index
    %c0_40 = arith.constant 0 : index
    %52 = vector.load %arg16[%c0_39, %c0_40] : memref<8x128xf32, #tpu.memory_space<vmem>>, vector<8x128xf32>
    tpu.vector_store %arg16[%c0_39, %c0_40], %51 {strides = array<i32>} : memref<8x128xf32, #tpu.memory_space<vmem>>, vector<8x128xf32>,
    return
  }
  func.func @transform_0(%arg0: i32) -> (i32, i32) {
    %c0_i32 = arith.constant 0 : i32
    %c0_i32_0 = arith.constant 0 : i32
    return %arg0, %c0_i32 : i32, i32
  }
  func.func @transform_1(%arg0: i32) -> (i32, i32) {
    %c0_i32 = arith.constant 0 : i32
    %c0_i32_0 = arith.constant 0 : i32
    return %arg0, %c0_i32 : i32, i32
  }
  func.func @transform_2(%arg0: i32) -> (i32, i32) {
    %c0_i32 = arith.constant 0 : i32
    %c0_i32_0 = arith.constant 0 : i32
    %c0_i32_1 = arith.constant 0 : i32
    return %c0_i32, %c0_i32_0 : i32, i32
  }
  func.func @transform_3(%arg0: i32) -> (i32, i32) {
    %c0_i32 = arith.constant 0 : i32
    %c0_i32_0 = arith.constant 0 : i32
    %c0_i32_1 = arith.constant 0 : i32
    return %c0_i32, %c0_i32_0 : i32, i32
  }
  func.func @transform_4(%arg0: i32) -> (i32, i32) {
    %c0_i32 = arith.constant 0 : i32
    %c0_i32_0 = arith.constant 0 : i32
    %c0_i32_1 = arith.constant 0 : i32
    return %c0_i32, %c0_i32_0 : i32, i32
  }
  func.func @transform_5(%arg0: i32) -> (i32, i32) {
    %c0_i32 = arith.constant 0 : i32
    %c0_i32_0 = arith.constant 0 : i32
    %c0_i32_1 = arith.constant 0 : i32
    return %c0_i32, %c0_i32_0 : i32, i32
  }
  func.func @transform_6(%arg0: i32) -> (i32, i32) {
    %c0_i32 = arith.constant 0 : i32
    %c0_i32_0 = arith.constant 0 : i32
    %c0_i32_1 = arith.constant 0 : i32
    return %c0_i32, %c0_i32_0 : i32, i32
  }
  func.func @transform_7(%arg0: i32) -> (i32, i32) {
    %c0_i32 = arith.constant 0 : i32
    %c0_i32_0 = arith.constant 0 : i32
    %c0_i32_1 = arith.constant 0 : i32
    return %c0_i32, %c0_i32_0 : i32, i32
  }
  func.func @transform_8(%arg0: i32) -> (i32, i32) {
    %c0_i32 = arith.constant 0 : i32
    %c0_i32_0 = arith.constant 0 : i32
    %c0_i32_1 = arith.constant 0 : i32
    return %c0_i32, %c0_i32_0 : i32, i32
  }
  func.func @transform_9(%arg0: i32) -> (i32, i32) {
    %c0_i32 = arith.constant 0 : i32
    %c0_i32_0 = arith.constant 0 : i32
    %c0_i32_1 = arith.constant 0 : i32
    return %c0_i32, %c0_i32_0 : i32, i32
  }
  func.func @transform_10(%arg0: i32) -> (i32, i32) {
    %c0_i32 = arith.constant 0 : i32
    %c0_i32_0 = arith.constant 0 : i32
    %c0_i32_1 = arith.constant 0 : i32
    return %c0_i32, %c0_i32_0 : i32, i32
  }
  func.func @transform_11(%arg0: i32) -> (i32, i32) {
    %c0_i32 = arith.constant 0 : i32
    %c0_i32_0 = arith.constant 0 : i32
    %c0_i32_1 = arith.constant 0 : i32
    return %c0_i32, %c0_i32_0 : i32, i32
  }
  func.func @transform_12(%arg0: i32) -> (i32, i32) {
    %c0_i32 = arith.constant 0 : i32
    %c0_i32_0 = arith.constant 0 : i32
    %c0_i32_1 = arith.constant 0 : i32
    return %c0_i32, %c0_i32_0 : i32, i32
  }
  func.func @transform_13(%arg0: i32) -> (i32, i32) {
    %c0_i32 = arith.constant 0 : i32
    %c0_i32_0 = arith.constant 0 : i32
    %c0_i32_1 = arith.constant 0 : i32
    return %c0_i32, %c0_i32_0 : i32, i32
  }
  func.func @transform_14(%arg0: i32) -> (i32, i32) {
    %c0_i32 = arith.constant 0 : i32
    %c0_i32_0 = arith.constant 0 : i32
    %c0_i32_1 = arith.constant 0 : i32
    return %c0_i32, %c0_i32_0 : i32, i32
  }
  func.func @transform_15(%arg0: i32) -> (i32, i32) {
    %c0_i32 = arith.constant 0 : i32
    %c0_i32_0 = arith.constant 0 : i32
    return %arg0, %c0_i32 : i32, i32
  }
}

</mosaic_0001>

<bundles_post_ra>
// kernel: tile.10
= control target key start
LH: loop header
LB: loop body
LE: loop exit
PB: predicated region body
PF: predicated region fallthrough
CT: control target
= control target key end

     0   :  { %s28_s0 = inlined_call_operand.vmem [shape: f32[29], index: 0, kind: input, shape index: {}]   ;;  %s29_s1 = inlined_call_operand.vmem [shape: f32[16,29], index: 1, kind: output, shape index: {}]  }
   0x1   :  { %v4_v0 = vld [vmem:[%s28_s0] ss:$0 sm:$0xff] }
   0x2   :  { %5 = vst [vmem:[%s29_s1] sm:$0xff] %v4_v0  ;;  %8 = vst [vmem:[%s29_s1 + $0x8] sm:$0xff] %v4_v0 }

// kernel: tile.11
= control target key start
LH: loop header
LB: loop body
LE: loop exit
PB: predicated region body
PF: predicated region fallthrough
CT: control target
= control target key end

     0   :  { %vm9_vm0 = vcmask 56320   ;;  %vm36_vm1 = vcmask 195584   ;;  %s168_s14 = smov 121   ;;  %vm23_vm2 = vcmask 97280   ;;  %s169_s19 = smov 104   ;;  %vm3_vm3 = vcmask 236544   ;;  %s253_s0 = inlined_call_operand.vmem [shape: f32[16,29], index: 0, kind: input, shape index: {}]   ;;  %s254_s1 = inlined_call_operand.vmem [shape: f32[464], index: 1, kind: output, shape index: {}]  }
   0x1   :  { %v135_v0 = vld [vmem:[%s253_s0 + $0xd] sm:$0x1]   ;;  %v139_v3 = vld [vmem:[%s253_s0 + $0x8] sm:$0x1]   ;;  %v137_v6 = vld [vmem:[%s253_s0 + $0x4] sm:$0x1]  }
   0x2   :  { %v136_v1 = vld [vmem:[%s253_s0 + $0xd] sm:$0x1]   ;;  %v140_v4 = vld [vmem:[%s253_s0 + $0x8] sm:$0x1]   ;;  %v138_v7 = vld [vmem:[%s253_s0 + $0x4] sm:$0x1]  }
   0x3   :  { %v10_v2 = vsel %vm9_vm0, %v136_v1, %v135_v0  ;;  %v37_v5 = vsel %vm36_vm1, %v140_v4, %v139_v3  ;;  %v24_v8 = vsel %vm23_vm2, %v138_v7, %v137_v6  ;;  %v141_v9 = vld [vmem:[%s253_s0 + $0xc] sm:$0x1]   ;;  %s170_s22 = smov 116   ;;  %s171_s23 = smov 92   ;;  %v142_v10 = vld [vmem:[%s253_s0 + $0x3] sm:$0x1]  }
   0x4   :  { %11 = vrot.lane.b32.xlu0 %v10_v2, %s168_s14  ;;  %38 = vrot.lane.b32.xlu1 %v37_v5, %s169_s19  ;;  %v143_v11 = vld [vmem:[%s253_s0 + $0x7] sm:$0x1]   ;;  %v2_v12 = vld [vmem:[%s253_s0] sm:$0x1]   ;;  %s172_s30 = smov 87   ;;  %s173_s2 = smov 75  }
   0x5   :  { %v144_v13 = vld [vmem:[%s253_s0 + $0xb] sm:$0x1]   ;;  %4 = vst.msk [vmem:[#allocation0] sm:$0x1] %vm3_vm3, %v2_v12   ;;  %v145_v14 = vld [vmem:[%s253_s0 + $0x2] sm:$0x1]  }
   0x6   :  { %s174_s7 = smov 63   ;;  %s175_s8 = smov 58   ;;  %v146_v15 = vld [vmem:[%s253_s0 + $0xf] sm:$0x1]   ;;  %v147_v16 = vld [vmem:[%s253_s0 + $0x6] sm:$0x1]  }
   0x7   :  { %s176_s13 = smov 51   ;;  %s177_s14 = smov 46   ;;  %v148_v17 = vld [vmem:[%s253_s0 + $0xa] sm:$0x1]   ;;  %v149_v18 = vld [vmem:[%s253_s0 + $0x1] sm:$0x1]  }
   0x8   :  { %25 = vrot.lane.b32.xlu0 %v24_v8, %s170_s22  ;;  %48 = vrot.lane.b32.xlu1 %v141_v9, %s171_s23  ;;  %s178_s19 = smov 34   ;;  %s179_s20 = smov 29   ;;  %v150_v19 = vld [vmem:[%s253_s0 + $0xe] sm:$0x1]   ;;  %v151_v20 = vld [vmem:[%s253_s0 + $0x5] sm:$0x1]  }
   0x9   :  { %s180_s25 = smov 22   ;;  %s181_s26 = smov 17   ;;  %v152_v21 = vld [vmem:[%s253_s0 + $0x9] sm:$0x1]   ;;  %vm13_vm4 = vcmask 179200   ;;  %vm16_vm5 = vcmask 1048520  }
   0xa   :  { %s182_s0 = smov 5   ;;  %vm40_vm6 = vcmask 39936   ;;  %vm27_vm7 = vcmask 138240   ;;  %vm30_vm8 = vcmask 1048480   ;;  %vm43_vm9 = vcmask 1048384  }
   0xb   :  { %vm50_vm10 = vcmask 990944   ;;  %vm57_vm11 = vcmask 949944   ;;  %vm63_vm12 = vcmask 851544   ;;  %vm70_vm13 = vcmask 753144  }
   0xc   :  { %55 = vrot.lane.b32.xlu0 %v142_v10, %s172_s30  ;;  %61 = vrot.lane.b32.xlu1 %v143_v11, %s173_s2  ;;  %vm77_vm14 = vcmask 712144   ;;  %vm83_vm15 = vcmask 654744   ;;  %vm90_vm0 = vcmask 613744   ;;  %vm97_vm1 = vcmask 515344  }
   0xd   :  { %vm104_vm2 = vcmask 474344   ;;  %vm110_vm3 = vcmask 416944  }
  0x10   :  { %68 = vrot.lane.b32.xlu0 %v144_v13, %s174_s7  ;;  %75 = vrot.lane.b32.xlu1 %v145_v14, %s175_s8 }
  0x14   :  { %81 = vrot.lane.b32.xlu0 %v146_v15, %s176_s13  ;;  %88 = vrot.lane.b32.xlu1 %v147_v16, %s177_s14 }
  0x18   :  { %95 = vrot.lane.b32.xlu0 %v148_v17, %s178_s19  ;;  %102 = vrot.lane.b32.xlu1 %v149_v18, %s179_s20 }
  0x1c   :  { %108 = vrot.lane.b32.xlu0 %v150_v19, %s180_s25  ;;  %115 = vrot.lane.b32.xlu1 %v151_v20, %s181_s26 }
  0x20   :  { %122 = vrot.lane.b32.xlu0 %v152_v21, %s182_s0 }
  0x76   :  { %v12_v22 = vpop.permute.xlu0 %11   ;;  %v39_v23 = vpop.permute.xlu1 %38  }
  0x77   :  { %15 = vst.msk [vmem:[#allocation0 + $0x3] sm:$0x1] %vm13_vm4, %v12_v22   ;;  %vm117_vm4 = vcmask 375944  }
  0x78   :  { %18 = vst.msk [vmem:[#allocation0 + $0x2] sm:$0x1] %vm16_vm5, %v12_v22   ;;  %vm124_vm5 = vcmask 277544  }
  0x79   :  { %42 = vst.msk [vmem:[#allocation0 + $0x2] sm:$0x1] %vm40_vm6, %v39_v23  }
  0x7a   :  { %v26_v24 = vpop.permute.xlu0 %25   ;;  %v49_v25 = vpop.permute.xlu1 %48  }
  0x7b   :  { %29 = vst.msk [vmem:[#allocation0 + $0x1] sm:$0x1] %vm27_vm7, %v26_v24  }
  0x7c   :  { %31 = vst.msk [vmem:[#allocation0] sm:$0x1] %vm30_vm8, %v26_v24  }
  0x7d   :  { %45 = vst.msk [vmem:[#allocation0 + $0x1] sm:$0x1] %vm43_vm9, %v39_v23  }
  0x7e   :  { %52 = vst.msk [vmem:[#allocation0 + $0x2] sm:$0x1] %vm50_vm10, %v49_v25   ;;  %v56_v26 = vpop.permute.xlu0 %55   ;;  %v62_v27 = vpop.permute.xlu1 %61  }
  0x7f   :  { %58 = vst.msk [vmem:[#allocation0] sm:$0x1] %vm57_vm11, %v56_v26  }
  0x80   :  { %65 = vst.msk [vmem:[#allocation0 + $0x1] sm:$0x1] %vm63_vm12, %v62_v27  }
  0x82   :  { %v69_v28 = vpop.permute.xlu0 %68   ;;  %v76_v29 = vpop.permute.xlu1 %75  }
  0x83   :  { %72 = vst.msk [vmem:[#allocation0 + $0x2] sm:$0x1] %vm70_vm13, %v69_v28  }
  0x84   :  { %78 = vst.msk [vmem:[#allocation0] sm:$0x1] %vm77_vm14, %v76_v29  }
  0x86   :  { %v82_v30 = vpop.permute.xlu0 %81   ;;  %v89_v31 = vpop.permute.xlu1 %88  }
  0x87   :  { %85 = vst.msk [vmem:[#allocation0 + $0x3] sm:$0x1] %vm83_vm15, %v82_v30  }
  0x88   :  { %92 = vst.msk [vmem:[#allocation0 + $0x1] sm:$0x1] %vm90_vm0, %v89_v31  }
  0x8a   :  { %v96_v32 = vpop.permute.xlu0 %95   ;;  %v103_v33 = vpop.permute.xlu1 %102  }
  0x8b   :  { %99 = vst.msk [vmem:[#allocation0 + $0x2] sm:$0x1] %vm97_vm1, %v96_v32  }
  0x8c   :  { %105 = vst.msk [vmem:[#allocation0] sm:$0x1] %vm104_vm2, %v103_v33  }
  0x8e   :  { %v109_v34 = vpop.permute.xlu0 %108   ;;  %v116_v35 = vpop.permute.xlu1 %115  }
  0x8f   :  { %112 = vst.msk [vmem:[#allocation0 + $0x3] sm:$0x1] %vm110_vm3, %v109_v34  }
  0x90   :  { %119 = vst.msk [vmem:[#allocation0 + $0x1] sm:$0x1] %vm117_vm4, %v116_v35  }
  0x92   :  { %v123_v36 = vpop.permute.xlu0 %122  }
  0x93   :  { %126 = vst.msk [vmem:[#allocation0 + $0x2] sm:$0x1] %vm124_vm5, %v123_v36  }
  0x9a   :  { %v131_v37 = vld [vmem:[#allocation0] sm:$0xf] }
  0x9b   :  { %134 = vst [vmem:[%s254_s1] sm:$0xf] %v131_v37 }

// kernel: speech_encoder_forward.2
= control target key start
LH: loop header
LB: loop body
LE: loop exit
PB: predicated region body
PF: predicated region fallthrough
CT: control target
= control target key end

     0   :  { %10 = vsyncpa [#allocation5], 0  ;;  %s134_s15 = smov [#allocation4]   ;;  %s192_s0 = inlined_call_operand.hbm [shape: f32[32,29], index: 0, kind: input, shape index: {}]   ;;  %s193_s1 = inlined_call_operand.vmem [shape: f32[1,29], index: 1, kind: input, shape index: {}]   ;;  %s194_s2 = inlined_call_operand.vmem [shape: f32[1,29], index: 2, kind: input, shape index: {}]   ;;  %s195_s3 = inlined_call_operand.vmem [shape: f32[1,29], index: 3, kind: output, shape index: {0}]   ;;  %s196_s4 = inlined_call_operand.vmem [shape: f32[1,29], index: 4, kind: output, shape index: {1}]  }
   0x1   :  { %s16_s16 = sshll.u32 %s134_s15, 4  ;;  %s17_s16 = int_to_ptr.vmem [resolvable:$true] %s16_s16 }
   0x2   :  { %s120_s17 = scalar_lea.vmem %s17_s16, 512  ;;  %p125_p1 = scmp.lt.s32.totalorder %s17_s16, %s17_s16 }
   0x3   :  { %p121_p0 = scmp.ne.s32.totalorder %s17_s16, %s120_s17  ;;  %p126_p2 = scmp.lt.s32.totalorder %s120_s17, %s120_s17 }
   0x5   :  { %p127_p3 = por %p126_p2, %p125_p1 }
   0x7   :  { %p128_p4 = pnand %p127_p3, %p121_p0 }
   0x9   :  { %131 = shalt.err (!%p128_p4)
}
   0xa   :  { %s135_s18 = smov 128   ;;  %s136_s19 = smov 8  }
   0xb   :  { %22 = dma.hbm_to_vmem [thread:$0]  %s192_s0, 512, %s17_s16, [#allocation5], %s135_s18, %s135_s18, %s136_s19  }
   0xc   :  { %132 = dma.done.wait [#allocation5], 512  }
   0xd   :  { %133 = vsyncadd [#allocation5], 4294966784  ;;  %vm34_vm0 = vcmask 229376   ;;  %v137_v0 = vmov 0.0   ;;  %vm42_vm1 = vcmask 236544   ;;  %v37_v1 = vld [vmem:[#allocation4] sm:$0xff] }
   0xe   :  { %35 = vst.msk [vmem:[#allocation2] sm:$0x1] %vm34_vm0, %v137_v0  ;;  %36 = vst.msk [vmem:[#allocation3] sm:$0x1] %vm34_vm0, %v137_v0  ;;  %v38_v2 = vld [vmem:[#allocation4 + $0x8] sm:$0xff]  ;;  %v39_v3 = vld [vmem:[#allocation4 + $0x10] sm:$0xff]  ;;  %v60_v8 = vmul.f32 %v37_v1, %v37_v1 }
   0xf   :  { %v40_v4 = vld [vmem:[#allocation4 + $0x18] sm:$0xff]  ;;  %v43_v5 = vsel %vm42_vm1, %v37_v1, 0.0  ;;  %v44_v6 = vsel %vm42_vm1, %v38_v2, 0.0  ;;  %v46_v7 = vsel %vm42_vm1, %v39_v3, 0.0  ;;  %v61_v10 = vmul.f32 %v38_v2, %v38_v2 }
  0x10   :  { %v45_v9 = vadd.f32 %v44_v6, %v43_v5  ;;  %v62_v11 = vmul.f32 %v39_v3, %v39_v3  ;;  %v48_v12 = vsel %vm42_vm1, %v40_v4, 0.0  ;;  %v63_v13 = vmul.f32 %v40_v4, %v40_v4  ;;  %v90_v46 = vld [vmem:[%s193_s1] sm:$0x1] }
  0x11   :  { %v64_v14 = vsel %vm42_vm1, %v60_v8, 0.0  ;;  %v65_v16 = vsel %vm42_vm1, %v61_v10, 0.0  ;;  %v92_v49 = vld [vmem:[%s194_s2] sm:$0x1] }
  0x12   :  { %v47_v15 = vadd.f32 %v46_v7, %v45_v9  ;;  %v67_v17 = vsel %vm42_vm1, %v62_v11, 0.0  ;;  %v66_v18 = vadd.f32 %v65_v16, %v64_v14  ;;  %v69_v20 = vsel %vm42_vm1, %v63_v13, 0.0 }
  0x14   :  { %v49_v19 = vadd.f32 %v48_v12, %v47_v15  ;;  %v68_v21 = vadd.f32 %v67_v17, %v66_v18 }
  0x15   :  { %v41_v31 = vld [vmem:[#allocation2] sm:$0x1]  ;;  %v59_v36 = vld [vmem:[#allocation3] sm:$0x1] }
  0x16   :  { %v50_v22 = vrot.slane %v49_v19, 4  ;;  %v70_v23 = vadd.f32 %v69_v20, %v68_v21 }
  0x18   :  { %v51_v24 = vadd.f32 %v50_v22, %v49_v19  ;;  %v71_v25 = vrot.slane %v70_v23, 4 }
  0x1a   :  { %v52_v26 = vrot.slane %v51_v24, 2  ;;  %v72_v27 = vadd.f32 %v71_v25, %v70_v23 }
  0x1c   :  { %v53_v28 = vadd.f32 %v52_v26, %v51_v24  ;;  %v73_v29 = vrot.slane %v72_v27, 2 }
  0x1e   :  { %v54_v30 = vrot.slane %v53_v28, 1  ;;  %v74_v32 = vadd.f32 %v73_v29, %v72_v27 }
  0x20   :  { %v55_v33 = vadd.f32 %v54_v30, %v53_v28  ;;  %v75_v34 = vrot.slane %v74_v32, 1 }
  0x22   :  { %v56_v35 = vadd.f32 %v55_v33, %v41_v31  ;;  %v76_v37 = vadd.f32 %v75_v34, %v74_v32 }
  0x24   :  { %58 = vst.msk [vmem:[#allocation2] sm:$0x1] %vm34_vm0, %v56_v35  ;;  %v77_v38 = vadd.f32 %v76_v37, %v59_v36 }
  0x26   :  { %78 = vst.msk [vmem:[#allocation3] sm:$0x1] %vm34_vm0, %v77_v38 }
  0x2b   :  { %v82_v39 = vld [vmem:[#allocation2] sm:$0x1] }
  0x2c   :  { %v83_v40 = vmul.f32 0.03125, %v82_v39 }
  0x2d   :  { %v84_v41 = vld [vmem:[#allocation3] sm:$0x1] }
  0x2e   :  { %v86_v42 = vmul.f32 %v83_v40, %v83_v40  ;;  %v85_v43 = vmul.f32 0.03125, %v84_v41 }
  0x30   :  { %v87_v44 = vsub.f32 %v85_v43, %v86_v42 }
  0x32   :  { %v88_v45 = vadd.f32 1e-05, %v87_v44 }
  0x34   :  { %110 = vrsqrt.f32 %v88_v45 }
  0x41   :  { %v111_v47 = vpop.eup %110 }
  0x42   :  { %v91_v48 = vmul.f32 %v111_v47, %v90_v46 }
  0x44   :  { %95 = vst.msk [vmem:[%s195_s3] sm:$0x1] %vm34_vm0, %v91_v48  ;;  %v93_v50 = vmul.f32 %v91_v48, %v83_v40 }
  0x46   :  { %v94_v51 = vsub.f32 %v92_v49, %v93_v50 }
  0x48   :  { %96 = vst.msk [vmem:[%s196_s4] sm:$0x1] %vm34_vm0, %v94_v51 }
  0x49   :  { %105 = vsyncpa [#allocation5], 1 }

// kernel: speech_encoder_forward.3
= control target key start
LH: loop header
LB: loop body
LE: loop exit
PB: predicated region body
PF: predicated region fallthrough
CT: control target
= control target key end

     0   :  { %vm66_vm0 = vcmask 1043456   ;;  %v1672_v1 = vmov 0   ;;  %vm62_vm1 = vcmask 64512   ;;  %v1673_v11 = vmov 0.0   ;;  %s2162_s4 = inlined_call_operand.vmem [shape: bf16[8,384], index: 4, kind: input, shape index: {}]   ;;  %s2163_s2 = inlined_call_operand.vmem [shape: bf16[512,256], index: 2, kind: input, shape index: {}]   ;;  %s2164_s1 = inlined_call_operand.vmem [shape: bf16[8,8], index: 1, kind: input, shape index: {}]   ;;  %s2165_s0 = inlined_call_operand.vmem [shape: bf16[8,512], index: 0, kind: input, shape index: {}]   ;;  %s2166_s5 = inlined_call_operand.vmem [shape: bf16[256,128], index: 5, kind: input, shape index: {}]   ;;  %s2167_s7 = inlined_call_operand.vmem [shape: bf16[128,128], index: 7, kind: input, shape index: {}]   ;;  %s2168_s3 = inlined_call_operand.vmem [shape: f32[1,256], index: 3, kind: input, shape index: {}]   ;;  %s2169_s9 = inlined_call_operand.vmem [shape: bf16[128,64], index: 9, kind: input, shape index: {}]   ;;  %s2170_s6 = inlined_call_operand.vmem [shape: f32[1,128], index: 6, kind: input, shape index: {}]   ;;  %s2171_s11 = inlined_call_operand.vmem [shape: bf16[64,128], index: 11, kind: input, shape index: {}]   ;;  %s2172_s8 = inlined_call_operand.vmem [shape: f32[1,128], index: 8, kind: input, shape index: {}]   ;;  %s2173_s13 = inlined_call_operand.vmem [shape: bf16[128,128], index: 13, kind: input, shape index: {}]   ;;  %s2174_s10 = inlined_call_operand.vmem [shape: f32[1,64], index: 10, kind: input, shape index: {}]   ;;  %s2175_s12 = inlined_call_operand.vmem [shape: f32[1,128], index: 12, kind: input, shape index: {}]   ;;  %s2176_s14 = inlined_call_operand.vmem [shape: f32[1,128], index: 14, kind: input, shape index: {}]   ;;  %s2177_s15 = inlined_call_operand.vmem [shape: f32[8,128], index: 15, kind: output, shape index: {}]  }
   0x1   :  { %v52_v0 = vld [vmem:[%s2162_s4] sm:$0xff]  ;;  %108 = vmatprep.mubr.bf16.mxu0 %v1672_v1  ;;  %v1524_v3 = vld [vmem:[%s2162_s4 + $0x8] ss:$0 sps:$4 sm:$0xff]   ;;  %v1526_v5 = vld [vmem:[%s2163_s2 + $0x174] ss:$8 sps:$4 sm:$0xff]   ;;  %vm1674_vm2 = vmmov 0  }
   0x2   :  { %v1263_v2 = vcombine.high %v52_v0, %v52_v0  ;;  %v1262_v4 = vcombine.low %v52_v0, %v52_v0  ;;  %v1528_v6 = vld [vmem:[%s2163_s2 + $0x170] ss:$8 sps:$4 sm:$0xff]   ;;  %v51_v8 = vld [vmem:[%s2164_s1] sm:$0xf]  ;;  %v1531_v9 = vld [vmem:[%s2163_s2 + $0x74] ss:$8 sps:$4 sm:$0xff]   ;;  %598 = vmatprep.subr.bf16.mxu1 %v1526_v5 }
   0x3   :  { %v1532_v10 = vld [vmem:[%s2163_s2 + $0x164] ss:$8 sps:$4 sm:$0xff]   ;;  %v74_v12 = vsel %vm66_vm0, %v1524_v3, 0  ;;  %599 = vmatpush1.bf16.msra.mxu1 %v1528_v6  ;;  %v1534_v13 = vld [vmem:[%s2163_s2 + $0x160] ss:$8 sps:$4 sm:$0xff]   ;;  %vm1092_vm3 = vcmask 523264  }
   0x4   :  { %1265 = vmatprep.subr.msk.bf16.mxu0 %vm66_vm0, %v1263_v2  ;;  %v68_v7 = vsel %vm66_vm0, %v1262_v4, 0  ;;  %600 = vmatprep.subr.bf16.mxu1 %v1532_v10  ;;  %v1538_v14 = vld [vmem:[%s2163_s2 + $0x154] ss:$8 sps:$4 sm:$0xff]   ;;  %v1540_v15 = vld [vmem:[%s2163_s2 + $0x150] ss:$8 sps:$4 sm:$0xff]   ;;  %v157_v50 = vld [vmem:[%s2165_s0] sm:$0xff] }
   0x5   :  { %91 = vmatpush1.bf16.msra.mxu0 %v68_v7  ;;  %v1544_v16 = vld [vmem:[%s2163_s2 + $0x144] ss:$8 sps:$4 sm:$0xff]   ;;  %v1529_v17 = vld [vmem:[%s2163_s2 + $0x70] ss:$8 sps:$4 sm:$0xff]   ;;  %v1546_v19 = vld [vmem:[%s2163_s2 + $0x140] ss:$8 sps:$4 sm:$0xff]   ;;  %v1269_v56 = vcombine.high %v157_v50, %v157_v50 }
   0x6   :  { %1442 = vmatprep.subr.bf16.mxu0 %v1673_v11  ;;  %v1537_v18 = vld [vmem:[%s2163_s2 + $0x64] ss:$8 sps:$4 sm:$0xff]   ;;  %v1550_v20 = vld [vmem:[%s2163_s2 + $0x134] ss:$8 sps:$4 sm:$0xff]   ;;  %v1535_v21 = vld [vmem:[%s2163_s2 + $0x60] ss:$8 sps:$4 sm:$0xff]  }
   0x7   :  { %601 = vmatpush1.bf16.msra.mxu1 %v1534_v13  ;;  %v1543_v22 = vld [vmem:[%s2163_s2 + $0x54] ss:$8 sps:$4 sm:$0xff]   ;;  %v1552_v23 = vld [vmem:[%s2163_s2 + $0x130] ss:$8 sps:$4 sm:$0xff]   ;;  %v1556_v24 = vld [vmem:[%s2163_s2 + $0x124] ss:$8 sps:$4 sm:$0xff]  }
   0x8   :  { %1266 = vmatmul.mubr.msk.bf16.vlgmr.msra.gmra.mxu0 %vm62_vm1, %v51_v8  ;;  %602 = vmatprep.subr.bf16.mxu1 %v1538_v14  ;;  %v1541_v25 = vld [vmem:[%s2163_s2 + $0x50] ss:$8 sps:$4 sm:$0xff]   ;;  %v1549_v26 = vld [vmem:[%s2163_s2 + $0x44] ss:$8 sps:$4 sm:$0xff]   ;;  %v1558_v27 = vld [vmem:[%s2163_s2 + $0x120] ss:$8 sps:$4 sm:$0xff]  }
   0x9   :  { %1443 = vmatpush3.bf16.msra.mxu0 %v74_v12  ;;  %1444 = vmatprep.mubr.msk.bf16.mxu0 %vm1674_vm2, %v1673_v11  ;;  %v1562_v28 = vld [vmem:[%s2163_s2 + $0x114] ss:$8 sps:$4 sm:$0xff]   ;;  %v1547_v29 = vld [vmem:[%s2163_s2 + $0x40] ss:$8 sps:$4 sm:$0xff]   ;;  %v1564_v31 = vld [vmem:[%s2163_s2 + $0x110] ss:$8 sps:$4 sm:$0xff]  }
   0xa   :  { %557 = vmatprep.subr.bf16.mxu0 %v1531_v9  ;;  %v1555_v30 = vld [vmem:[%s2163_s2 + $0x34] ss:$8 sps:$4 sm:$0xff]   ;;  %v1568_v32 = vld [vmem:[%s2163_s2 + $0x104] ss:$8 sps:$4 sm:$0xff]   ;;  %v1553_v33 = vld [vmem:[%s2163_s2 + $0x30] ss:$8 sps:$4 sm:$0xff]  }
   0xb   :  { %603 = vmatpush1.bf16.msra.mxu1 %v1540_v15  ;;  %v1561_v34 = vld [vmem:[%s2163_s2 + $0x24] ss:$8 sps:$4 sm:$0xff]   ;;  %v1570_v35 = vld [vmem:[%s2163_s2 + $0x100] ss:$8 sps:$4 sm:$0xff]   ;;  %v1574_v36 = vld [vmem:[%s2163_s2 + $0x1f4] ss:$8 sps:$4 sm:$0xff]   ;;  %v1268_v15 = vcombine.low %v157_v50, %v157_v50 }
   0xc   :  { %604 = vmatprep.subr.bf16.mxu1 %v1544_v16  ;;  %v1559_v37 = vld [vmem:[%s2163_s2 + $0x20] ss:$8 sps:$4 sm:$0xff]   ;;  %v1567_v38 = vld [vmem:[%s2163_s2 + $0x14] ss:$8 sps:$4 sm:$0xff]   ;;  %v1576_v39 = vld [vmem:[%s2163_s2 + $0x1f0] ss:$8 sps:$4 sm:$0xff]  }
   0xd   :  { %v1580_v40 = vld [vmem:[%s2163_s2 + $0x1e4] ss:$8 sps:$4 sm:$0xff]   ;;  %v1565_v41 = vld [vmem:[%s2163_s2 + $0x10] ss:$8 sps:$4 sm:$0xff]   ;;  %v1582_v43 = vld [vmem:[%s2163_s2 + $0x1e0] ss:$8 sps:$4 sm:$0xff]  }
   0xe   :  { %v1573_v42 = vld [vmem:[%s2163_s2 + $0x4] ss:$8 sps:$4 sm:$0xff]   ;;  %v1586_v44 = vld [vmem:[%s2163_s2 + $0x1d4] ss:$8 sps:$4 sm:$0xff]   ;;  %v1571_v45 = vld [vmem:[%s2163_s2] ss:$8 sps:$4 sm:$0xff]  }
   0xf   :  { %605 = vmatpush1.bf16.msra.mxu1 %v1546_v19  ;;  %v1579_v46 = vld [vmem:[%s2163_s2 + $0xf4] ss:$8 sps:$4 sm:$0xff]   ;;  %v1588_v47 = vld [vmem:[%s2163_s2 + $0x1d0] ss:$8 sps:$4 sm:$0xff]   ;;  %v1592_v48 = vld [vmem:[%s2163_s2 + $0x1c4] ss:$8 sps:$4 sm:$0xff]  }
  0x10   :  { %1445 = vmatmul.mubr.msk.bf16.vlgmr.msra.gmra.mxu0 %vm62_vm1, %v51_v8  ;;  %606 = vmatprep.subr.bf16.mxu1 %v1550_v20  ;;  %v1577_v49 = vld [vmem:[%s2163_s2 + $0xf0] ss:$8 sps:$4 sm:$0xff]   ;;  %v158_v51 = vld [vmem:[%s2165_s0 + $0x8] sm:$0xff]  ;;  %v1598_v55 = vld [vmem:[%s2163_s2 + $0x1b4] ss:$8 sps:$4 sm:$0xff]  }
  0x11   :  { %558 = vmatpush1.bf16.msra.mxu0 %v1529_v17  ;;  %v1585_v52 = vld [vmem:[%s2163_s2 + $0xe4] ss:$8 sps:$4 sm:$0xff]   ;;  %v1594_v53 = vld [vmem:[%s2163_s2 + $0x1c0] ss:$8 sps:$4 sm:$0xff]   ;;  %v1271_v54 = vcombine.high %v158_v51, %v158_v51  ;;  %589 = vmatprep.mubr.bf16.mxu0 %v1269_v56  ;;  %v1591_v58 = vld [vmem:[%s2163_s2 + $0xd4] ss:$8 sps:$4 sm:$0xff]   ;;  %v1270_v9 = vcombine.low %v158_v51, %v158_v51 }
  0x12   :  { %559 = vmatprep.subr.bf16.mxu0 %v1537_v18  ;;  %v1583_v57 = vld [vmem:[%s2163_s2 + $0xe0] ss:$8 sps:$4 sm:$0xff]   ;;  %v1600_v59 = vld [vmem:[%s2163_s2 + $0x1b0] ss:$8 sps:$4 sm:$0xff]   ;;  %v1604_v60 = vld [vmem:[%s2163_s2 + $0x1a4] ss:$8 sps:$4 sm:$0xff]  }
  0x13   :  { %607 = vmatpush1.bf16.msra.mxu1 %v1552_v23  ;;  %630 = vmatprep.mubr.bf16.mxu1 %v1271_v54  ;;  %v1589_v61 = vld [vmem:[%s2163_s2 + $0xd0] ss:$8 sps:$4 sm:$0xff]   ;;  %v1597_v62 = vld [vmem:[%s2163_s2 + $0xc4] ss:$8 sps:$4 sm:$0xff]   ;;  %v1606_v63 = vld [vmem:[%s2163_s2 + $0x1a0] ss:$8 sps:$4 sm:$0xff]  }
  0x14   :  { %608 = vmatprep.subr.bf16.mxu1 %v1556_v24  ;;  %v1610_v0 = vld [vmem:[%s2163_s2 + $0x194] ss:$8 sps:$4 sm:$0xff]   ;;  %v1595_v1 = vld [vmem:[%s2163_s2 + $0xc0] ss:$8 sps:$4 sm:$0xff]   ;;  %v1612_v3 = vld [vmem:[%s2163_s2 + $0x190] ss:$8 sps:$4 sm:$0xff]  }
  0x15   :  { %560 = vmatpush1.bf16.msra.mxu0 %v1535_v21  ;;  %v1603_v2 = vld [vmem:[%s2163_s2 + $0xb4] ss:$8 sps:$4 sm:$0xff]   ;;  %v1616_v4 = vld [vmem:[%s2163_s2 + $0x184] ss:$8 sps:$4 sm:$0xff]   ;;  %v1601_v5 = vld [vmem:[%s2163_s2 + $0xb0] ss:$8 sps:$4 sm:$0xff]  }
  0x16   :  { %561 = vmatprep.subr.bf16.mxu0 %v1543_v22  ;;  %v1609_v6 = vld [vmem:[%s2163_s2 + $0xa4] ss:$8 sps:$4 sm:$0xff]   ;;  %v1618_v7 = vld [vmem:[%s2163_s2 + $0x180] ss:$8 sps:$4 sm:$0xff]   ;;  %v1615_v10 = vld [vmem:[%s2163_s2 + $0x94] ss:$8 sps:$4 sm:$0xff]  }
  0x17   :  { %609 = vmatpush1.bf16.msra.mxu1 %v1558_v27  ;;  %v1607_v8 = vld [vmem:[%s2163_s2 + $0xa0] ss:$8 sps:$4 sm:$0xff]   ;;  %v1613_v12 = vld [vmem:[%s2163_s2 + $0x90] ss:$8 sps:$4 sm:$0xff]   ;;  %v1621_v13 = vld [vmem:[%s2163_s2 + $0x84] ss:$8 sps:$4 sm:$0xff]  }
  0x18   :  { %610 = vmatprep.subr.bf16.mxu1 %v1562_v28  ;;  %v1619_v14 = vld [vmem:[%s2163_s2 + $0x80] ss:$8 sps:$4 sm:$0xff]   ;;  %v1626_v16 = vld [vmem:[%s2166_s5 + $0x78] sm:$0xff]   ;;  %v1628_v18 = vld [vmem:[%s2166_s5 + $0x70] sm:$0xff]  }
  0x19   :  { %562 = vmatpush1.bf16.msra.mxu0 %v1541_v25  ;;  %v1627_v17 = vld [vmem:[%s2166_s5 + $0x38] sm:$0xff]   ;;  %v1629_v19 = vld [vmem:[%s2166_s5 + $0x30] sm:$0xff]   ;;  %v1630_v20 = vld [vmem:[%s2166_s5 + $0x68] sm:$0xff]  }
  0x1a   :  { %563 = vmatprep.subr.bf16.mxu0 %v1549_v26  ;;  %v1631_v21 = vld [vmem:[%s2166_s5 + $0x28] sm:$0xff]   ;;  %v1632_v22 = vld [vmem:[%s2166_s5 + $0x60] sm:$0xff]   ;;  %v1634_v24 = vld [vmem:[%s2166_s5 + $0x58] sm:$0xff]  }
  0x1b   :  { %611 = vmatpush1.bf16.msra.mxu1 %v1564_v31  ;;  %v1633_v23 = vld [vmem:[%s2166_s5 + $0x20] sm:$0xff]   ;;  %v1635_v25 = vld [vmem:[%s2166_s5 + $0x18] sm:$0xff]   ;;  %v1636_v26 = vld [vmem:[%s2166_s5 + $0x50] sm:$0xff]  }
  0x1c   :  { %612 = vmatprep.subr.bf16.mxu1 %v1568_v32  ;;  %v1637_v27 = vld [vmem:[%s2166_s5 + $0x10] sm:$0xff]   ;;  %v1638_v28 = vld [vmem:[%s2166_s5 + $0x48] sm:$0xff]   ;;  %v1641_v31 = vld [vmem:[%s2166_s5] sm:$0xff]  }
  0x1d   :  { %564 = vmatpush1.bf16.msra.mxu0 %v1547_v29  ;;  %v1639_v29 = vld [vmem:[%s2166_s5 + $0x8] sm:$0xff]   ;;  %v1642_v32 = vld [vmem:[%s2167_s7 + $0x38] sm:$0xff]  }
  0x1e   :  { %565 = vmatprep.subr.bf16.mxu0 %v1555_v30  ;;  %v1640_v30 = vld [vmem:[%s2166_s5 + $0x40] sm:$0xff]  }
  0x1f   :  { %613 = vmatpush1.bf16.msra.mxu1 %v1570_v35  ;;  %v1645_v35 = vld [vmem:[%s2167_s7 + $0x20] sm:$0xff]  }
  0x20   :  { %614 = vmatprep.subr.bf16.mxu1 %v1574_v36  ;;  %v1646_v36 = vld [vmem:[%s2167_s7 + $0x18] sm:$0xff]  }
  0x21   :  { %566 = vmatpush1.bf16.msra.mxu0 %v1553_v33  ;;  %v1643_v33 = vld [vmem:[%s2167_s7 + $0x30] sm:$0xff]  }
  0x22   :  { %567 = vmatprep.subr.bf16.mxu0 %v1561_v34  ;;  %v1644_v34 = vld [vmem:[%s2167_s7 + $0x28] sm:$0xff]  }
  0x23   :  { %615 = vmatpush2.bf16.msra.mxu1 %v1576_v39 }
  0x24   :  { %616 = vmatprep.subr.bf16.mxu1 %v1580_v40 }
  0x25   :  { %568 = vmatpush1.bf16.msra.mxu0 %v1559_v37 }
  0x26   :  { %569 = vmatprep.subr.bf16.mxu0 %v1567_v38 }
  0x27   :  { %617 = vmatpush2.bf16.msra.mxu1 %v1582_v43 }
  0x28   :  { %618 = vmatprep.subr.bf16.mxu1 %v1586_v44 }
  0x29   :  { %570 = vmatpush1.bf16.msra.mxu0 %v1565_v41 }
  0x2a   :  { %571 = vmatprep.subr.bf16.mxu0 %v1573_v42 }
  0x2b   :  { %619 = vmatpush2.bf16.msra.mxu1 %v1588_v47 }
  0x2c   :  { %620 = vmatprep.subr.bf16.mxu1 %v1592_v48 }
  0x2d   :  { %572 = vmatpush1.bf16.msra.mxu0 %v1571_v45 }
  0x2e   :  { %573 = vmatprep.subr.bf16.mxu0 %v1579_v46  ;;  %v641_v46 = vlaneseq }
  0x2f   :  { %621 = vmatpush2.bf16.msra.mxu1 %v1594_v53 }
  0x30   :  { %622 = vmatprep.subr.bf16.mxu1 %v1598_v55  ;;  %v642_v48 = vshrl.u32 %v641_v46, 7  ;;  %v1662_v46 = vld [vmem:[%s2173_s13 + $0x38] sm:$0xff]  }
  0x31   :  { %574 = vmatpush2.bf16.msra.mxu0 %v1577_v49 }
  0x32   :  { %575 = vmatprep.subr.bf16.mxu0 %v1585_v52  ;;  %v643_v51 = vsub.s32 0, %v642_v48  ;;  %v639_v52 = vld [vmem:[%s2168_s3] sm:$0x3]  ;;  %v647_v53 = vsub.s32 1, %v642_v48 }
  0x33   :  { %623 = vmatpush2.bf16.msra.mxu1 %v1600_v59 }
  0x34   :  { %624 = vmatprep.subr.bf16.mxu1 %v1604_v60  ;;  %v644_v56 = vrot.slane %v639_v52, %v643_v51  ;;  %v648_v60 = vrot.slane %v639_v52, %v647_v53  ;;  %v1665_v51 = vld [vmem:[%s2173_s13 + $0x20] sm:$0xff]   ;;  %v1666_v52 = vld [vmem:[%s2173_s13 + $0x18] sm:$0xff]   ;;  %v1667_v53 = vld [vmem:[%s2173_s13 + $0x10] sm:$0xff]  }
  0x35   :  { %576 = vmatpush2.bf16.msra.mxu0 %v1583_v57 }
  0x36   :  { %577 = vmatprep.subr.bf16.mxu0 %v1591_v58 }
  0x37   :  { %625 = vmatpush2.bf16.msra.mxu1 %v1606_v63 }
  0x38   :  { %626 = vmatprep.subr.bf16.mxu1 %v1610_v0 }
  0x39   :  { %578 = vmatpush2.bf16.msra.mxu0 %v1589_v61 }
  0x3a   :  { %579 = vmatprep.subr.bf16.mxu0 %v1597_v62 }
  0x3b   :  { %627 = vmatpush2.bf16.msra.mxu1 %v1612_v3 }
  0x3c   :  { %628 = vmatprep.subr.bf16.mxu1 %v1616_v4 }
  0x3d   :  { %580 = vmatpush2.bf16.msra.mxu0 %v1595_v1 }
  0x3e   :  { %581 = vmatprep.subr.bf16.mxu0 %v1603_v2 }
  0x3f   :  { %629 = vmatpush2.bf16.msra.mxu1 %v1618_v7  ;;  %v1648_v7 = vld [vmem:[%s2167_s7 + $0x8] sm:$0xff]  }
  0x40   :  { %1448 = vmatprep.subr.bf16.mxu1 %v1673_v11 }
  0x41   :  { %582 = vmatpush2.bf16.msra.mxu0 %v1601_v5 }
  0x42   :  { %583 = vmatprep.subr.bf16.mxu0 %v1609_v6  ;;  %631 = vmatmul.mubr.bf16.vlgmr.msra.gmra.mxu1 %v1270_v9  ;;  %v1647_v6 = vld [vmem:[%s2167_s7 + $0x10] sm:$0xff]   ;;  %v1650_v9 = vld [vmem:[%s2169_s9 + $0x38] sm:$0xff]  }
  0x43   :  { %1464 = vmatprep.mubr.msk.bf16.mxu1 %vm1674_vm2, %v1673_v11  ;;  %1449 = vmatpush3.bf16.msra.mxu1 %v1642_v32 }
  0x44   :  { %1450 = vmatprep.subr.bf16.mxu1 %v1673_v11 }
  0x45   :  { %584 = vmatpush2.bf16.msra.mxu0 %v1607_v8  ;;  %v1649_v8 = vld [vmem:[%s2167_s7] sm:$0xff]  }
  0x46   :  { %585 = vmatprep.subr.bf16.mxu0 %v1615_v10  ;;  %v1651_v10 = vld [vmem:[%s2169_s9 + $0x30] sm:$0xff]  }
  0x47   :  { %1451 = vmatpush3.bf16.msra.mxu1 %v1643_v33 }
  0x48   :  { %1452 = vmatprep.subr.bf16.mxu1 %v1673_v11 }
  0x49   :  { %586 = vmatpush2.bf16.msra.mxu0 %v1613_v12  ;;  %v1652_v12 = vld [vmem:[%s2169_s9 + $0x28] sm:$0xff]  }
  0x4a   :  { %587 = vmatprep.subr.bf16.mxu0 %v1621_v13  ;;  %v1653_v13 = vld [vmem:[%s2169_s9 + $0x20] sm:$0xff]  }
  0x4b   :  { %1453 = vmatpush3.bf16.msra.mxu1 %v1644_v34 }
  0x4c   :  { %1454 = vmatprep.subr.bf16.mxu1 %v1673_v11 }
  0x4d   :  { %588 = vmatpush2.bf16.msra.mxu0 %v1619_v14  ;;  %v1654_v14 = vld [vmem:[%s2169_s9 + $0x18] sm:$0xff]  }
  0x4e   :  { %1388 = vmatprep.subr.bf16.mxu0 %v1626_v16 }
  0x4f   :  { %1455 = vmatpush3.bf16.msra.mxu1 %v1645_v35 }
  0x50   :  { %590 = vmatmul.mubr.bf16.vlgmr.msra.gmra.mxu0 %v1268_v15  ;;  %1456 = vmatprep.subr.bf16.mxu1 %v1673_v11  ;;  %v1655_v15 = vld [vmem:[%s2169_s9 + $0x10] sm:$0xff]  }
  0x51   :  { %1389 = vmatpush3.bf16.msra.mxu0 %v1627_v17  ;;  %v1336_v17 = vld [vmem:[%s2170_s6] ss:$0 sm:$0xff] }
  0x52   :  { %1390 = vmatprep.subr.bf16.mxu0 %v1628_v18 }
  0x53   :  { %1457 = vmatpush3.bf16.msra.mxu1 %v1646_v36 }
  0x54   :  { %1458 = vmatprep.subr.bf16.mxu1 %v1673_v11 }
  0x55   :  { %1391 = vmatpush3.bf16.msra.mxu0 %v1629_v19 }
  0x56   :  { %1392 = vmatprep.subr.bf16.mxu0 %v1630_v20 }
  0x57   :  { %1459 = vmatpush3.bf16.msra.mxu1 %v1647_v6 }
  0x58   :  { %1460 = vmatprep.subr.bf16.mxu1 %v1673_v11 }
  0x59   :  { %1393 = vmatpush3.bf16.msra.mxu0 %v1631_v21 }
  0x5a   :  { %1394 = vmatprep.subr.bf16.mxu0 %v1632_v22 }
  0x5b   :  { %1461 = vmatpush3.bf16.msra.mxu1 %v1648_v7 }
  0x5c   :  { %1462 = vmatprep.subr.bf16.mxu1 %v1673_v11 }
  0x5d   :  { %1395 = vmatpush3.bf16.msra.mxu0 %v1633_v23 }
  0x5e   :  { %1396 = vmatprep.subr.bf16.mxu0 %v1634_v24 }
  0x5f   :  { %1463 = vmatpush3.bf16.msra.mxu1 %v1649_v8 }
  0x60   :  { %1488 = vmatprep.subr.bf16.mxu1 %v1673_v11 }
  0x61   :  { %1397 = vmatpush3.bf16.msra.mxu0 %v1635_v25  ;;  %v1656_v25 = vld [vmem:[%s2169_s9 + $0x8] sm:$0xff]  }
  0x62   :  { %1398 = vmatprep.subr.bf16.mxu0 %v1636_v26  ;;  %v1657_v26 = vld [vmem:[%s2169_s9] sm:$0xff]  }
  0x65   :  { %1399 = vmatpush3.bf16.msra.mxu0 %v1637_v27  ;;  %v1658_v27 = vld [vmem:[%s2171_s11 + $0x18] sm:$0xff]  }
  0x66   :  { %1400 = vmatprep.subr.bf16.mxu0 %v1638_v28  ;;  %v1659_v28 = vld [vmem:[%s2171_s11 + $0x10] sm:$0xff]  }
  0x69   :  { %1401 = vmatpush3.bf16.msra.mxu0 %v1639_v29  ;;  %v1353_v29 = vld [vmem:[%s2172_s8] ss:$0 sm:$0xff] }
  0x6a   :  { %1402 = vmatprep.subr.bf16.mxu0 %v1640_v30 }
  0x6d   :  { %1403 = vmatpush3.bf16.msra.mxu0 %v1641_v31 }
  0x6e   :  { %1468 = vmatprep.subr.bf16.mxu0 %v1673_v11 }
  0xc8   :  { %v110_v37 = vpop.f32.mrf.mxu0 }
  0xca   :  { %v112_v38 = vpop.f32.mrf.mxu0 }
  0xcc   :  { %v114_v39 = vpop.f32.mrf.mxu0 }
  0xcd   :  { %v1362_v39 = vld [vmem:[%s2174_s10] ss:$0 sm:$0xff] }
  0xce   :  { %v115_v40 = vpop.f32.mrf.mxu0 }
  0xd0   :  { %v2042_v41 = vpop.f32.mrf.mxu0 }
  0xd2   :  { %v1446_v42 = vpop.f32.mrf.mxu0 }
  0xd4   :  { %v154_v43 = vpop.f32.mrf.mxu0 }
  0xd6   :  { %v1447_v44 = vpop.f32.mrf.mxu0 }
 0x102   :  { %v632_v45 = vpop.f32.mrf.mxu1 }
 0x104   :  { %v634_v47 = vpop.f32.mrf.mxu1 }
 0x106   :  { %v636_v49 = vpop.f32.mrf.mxu1 }
 0x107   :  { %v1663_v49 = vld [vmem:[%s2173_s13 + $0x30] sm:$0xff]  }
 0x108   :  { %v637_v50 = vpop.f32.mrf.mxu1 }
 0x109   :  { %v1664_v50 = vld [vmem:[%s2173_s13 + $0x28] sm:$0xff]  }
 0x110   :  { %v591_v54 = vpop.f32.mrf.mxu0 }
 0x111   :  { %v592_v55 = vadd.f32 %v591_v54, %v110_v37  ;;  %v1660_v37 = vld [vmem:[%s2171_s11 + $0x8] sm:$0xff]  }
 0x112   :  { %v593_v57 = vpop.f32.mrf.mxu0  ;;  %v1668_v54 = vld [vmem:[%s2173_s13 + $0x8] sm:$0xff]  }
 0x113   :  { %v633_v58 = vadd.f32 %v632_v45, %v592_v55  ;;  %v594_v59 = vadd.f32 %v593_v57, %v112_v38  ;;  %v1661_v38 = vld [vmem:[%s2171_s11] sm:$0xff]  }
 0x114   :  { %v595_v61 = vpop.f32.mrf.mxu0  ;;  %v1669_v55 = vld [vmem:[%s2173_s13] sm:$0xff]  }
 0x115   :  { %v651_v62 = vadd.f32 %v644_v56, %v633_v58  ;;  %v635_v63 = vadd.f32 %v634_v47, %v594_v59  ;;  %v1376_v57 = vld [vmem:[%s2175_s12] ss:$0 sm:$0xff] }
 0x116   :  { %v596_v0 = vpop.f32.mrf.mxu0 }
 0x117   :  { %v652_v1 = vadd.f32 %v648_v60, %v635_v63  ;;  %v653_v2 = vmax.f32 %v651_v62, 0.0 }
 0x119   :  { %v654_v3 = vmax.f32 %v652_v1, 0.0  ;;  %v655_v5 = vpack.c.bf16 %v653_v2, %v653_v2 }
 0x11b   :  { %v656_v4 = vpack.c.bf16 %v654_v3, %v654_v3 }
 0x11d   :  { %824 = vmatprep.mubr.bf16.mxu0 %v656_v4 }
 0x11e   :  { %825 = vmatmul.mubr.bf16.vlgmr.msra.gmra.mxu0 %v655_v5 }
 0x11f   :  { %1484 = vmatprep.mubr.msk.bf16.mxu0 %vm1674_vm2, %v1673_v11  ;;  %1469 = vmatpush3.bf16.msra.mxu0 %v1650_v9 }
 0x120   :  { %1470 = vmatprep.subr.bf16.mxu0 %v1673_v11 }
 0x123   :  { %1471 = vmatpush3.bf16.msra.mxu0 %v1651_v10 }
 0x124   :  { %1472 = vmatprep.subr.bf16.mxu0 %v1673_v11 }
 0x127   :  { %1473 = vmatpush3.bf16.msra.mxu0 %v1652_v12 }
 0x128   :  { %1474 = vmatprep.subr.bf16.mxu0 %v1673_v11 }
 0x12b   :  { %1475 = vmatpush3.bf16.msra.mxu0 %v1653_v13 }
 0x12c   :  { %1476 = vmatprep.subr.bf16.mxu0 %v1673_v11 }
 0x12f   :  { %1477 = vmatpush3.bf16.msra.mxu0 %v1654_v14 }
 0x130   :  { %1478 = vmatprep.subr.bf16.mxu0 %v1673_v11 }
 0x133   :  { %1479 = vmatpush3.bf16.msra.mxu0 %v1655_v15 }
 0x134   :  { %1480 = vmatprep.subr.bf16.mxu0 %v1673_v11 }
 0x137   :  { %1481 = vmatpush3.bf16.msra.mxu0 %v1656_v25 }
 0x138   :  { %1482 = vmatprep.subr.bf16.mxu0 %v1673_v11 }
 0x13b   :  { %1483 = vmatpush3.bf16.msra.mxu0 %v1657_v26 }
 0x1de   :  { %v1404_v16 = vpop.f32.mrf.mxu0 }
 0x1e0   :  { %v1405_v18 = vpop.f32.mrf.mxu0 }
 0x1e1   :  { %v1406_v19 = vadd.f32 %v1405_v18, %v1404_v16 }
 0x1e2   :  { %v1407_v20 = vpop.f32.mrf.mxu0 }
 0x1e3   :  { %v827_v21 = vadd.f32 %v1406_v19, %v1336_v17 }
 0x1e4   :  { %v1408_v22 = vpop.f32.mrf.mxu0 }
 0x1e5   :  { %v832_v23 = vmax.f32 %v827_v21, 0.0 }
 0x1e7   :  { %v833_v24 = vpack.c.bf16 %v832_v23, %v832_v23 }
 0x1e9   :  { %1465 = vmatmul.mubr.bf16.vlgmr.msra.gmra.mxu1 %v833_v24 }
 0x1ea   :  { %1496 = vmatprep.mubr.msk.bf16.mxu1 %vm1674_vm2, %v1673_v11  ;;  %1489 = vmatpush3.bf16.msra.mxu1 %v1658_v27 }
 0x1eb   :  { %1490 = vmatprep.subr.bf16.mxu1 %v1673_v11 }
 0x1ee   :  { %1491 = vmatpush3.bf16.msra.mxu1 %v1659_v28 }
 0x1ef   :  { %1492 = vmatprep.subr.bf16.mxu1 %v1673_v11 }
 0x1f2   :  { %1493 = vmatpush3.bf16.msra.mxu1 %v1660_v37 }
 0x1f3   :  { %1494 = vmatprep.subr.bf16.mxu1 %v1673_v11 }
 0x1f6   :  { %1495 = vmatpush3.bf16.msra.mxu1 %v1661_v38 }
 0x1f7   :  { %1500 = vmatprep.subr.bf16.mxu1 %v1673_v11 }
 0x2a9   :  { %v939_v30 = vpop.f32.mrf.mxu1 }
 0x2aa   :  { %v940_v31 = vadd.f32 %v1353_v29, %v939_v30 }
 0x2ab   :  { %v1466_v32 = vpop.f32.mrf.mxu1 }
 0x2ac   :  { %v945_v33 = vmax.f32 %v940_v31, 0.0 }
 0x2ad   :  { %v942_v34 = vpop.f32.mrf.mxu1 }
 0x2ae   :  { %v946_v35 = vpack.c.bf16 %v945_v33, %v945_v33 }
 0x2af   :  { %v1467_v36 = vpop.f32.mrf.mxu1 }
 0x2b0   :  { %1485 = vmatmul.mubr.bf16.vlgmr.msra.gmra.mxu0 %v946_v35 }
 0x370   :  { %v1052_v40 = vpop.f32.mrf.mxu0 }
 0x371   :  { %v1053_v42 = vadd.f32 %v1362_v39, %v1052_v40 }
 0x372   :  { %v1486_v43 = vpop.f32.mrf.mxu0 }
 0x373   :  { %v1058_v44 = vmax.f32 %v1053_v42, 0.0 }
 0x374   :  { %v1055_v45 = vpop.f32.mrf.mxu0 }
 0x375   :  { %v1059_v47 = vpack.c.bf16 %v1058_v44, %v1058_v44 }
 0x376   :  { %v1487_v48 = vpop.f32.mrf.mxu0 }
 0x377   :  { %1497 = vmatmul.mubr.msk.bf16.vlgmr.msra.gmra.mxu1 %vm1092_vm3, %v1059_v47 }
 0x378   :  { %1501 = vmatpush3.bf16.msra.mxu1 %v1662_v46  ;;  %1516 = vmatprep.mubr.msk.bf16.mxu1 %vm1674_vm2, %v1673_v11 }
 0x379   :  { %1502 = vmatprep.subr.bf16.mxu1 %v1673_v11 }
 0x37c   :  { %1503 = vmatpush3.bf16.msra.mxu1 %v1663_v49 }
 0x37d   :  { %1504 = vmatprep.subr.bf16.mxu1 %v1673_v11 }
 0x380   :  { %1505 = vmatpush3.bf16.msra.mxu1 %v1664_v50 }
 0x381   :  { %1506 = vmatprep.subr.bf16.mxu1 %v1673_v11 }
 0x384   :  { %1507 = vmatpush3.bf16.msra.mxu1 %v1665_v51 }
 0x385   :  { %1508 = vmatprep.subr.bf16.mxu1 %v1673_v11 }
 0x388   :  { %1509 = vmatpush3.bf16.msra.mxu1 %v1666_v52 }
 0x389   :  { %1510 = vmatprep.subr.bf16.mxu1 %v1673_v11 }
 0x38c   :  { %1511 = vmatpush3.bf16.msra.mxu1 %v1667_v53 }
 0x38d   :  { %1512 = vmatprep.subr.bf16.mxu1 %v1673_v11 }
 0x390   :  { %1513 = vmatpush3.bf16.msra.mxu1 %v1668_v54 }
 0x391   :  { %1514 = vmatprep.subr.bf16.mxu1 %v1673_v11  ;;  %v1377_v11 = vld [vmem:[%s2176_s14] ss:$0 sm:$0xff] }
 0x394   :  { %1515 = vmatpush3.bf16.msra.mxu1 %v1669_v55 }
 0x437   :  { %v1130_v56 = vpop.f32.mrf.mxu1 }
 0x438   :  { %v1131_v58 = vadd.f32 %v1130_v56, %v2042_v41 }
 0x439   :  { %v1498_v59 = vpop.f32.mrf.mxu1 }
 0x43a   :  { %v1143_v60 = vadd.f32 %v1376_v57, %v1131_v58 }
 0x43b   :  { %v1133_v61 = vpop.f32.mrf.mxu1 }
 0x43c   :  { %1670 = vtanh.f32 %v1143_v60 }
 0x43d   :  { %v1499_v62 = vpop.f32.mrf.mxu1 }
 0x449   :  { %v1671_v63 = vpop.eup %1670 }
 0x44a   :  { %v1145_v0 = vpack.c.bf16 %v1671_v63, %v1671_v63 }
 0x44c   :  { %1517 = vmatmul.mubr.bf16.vlgmr.msra.gmra.mxu1 %v1145_v0 }
 0x50c   :  { %v1251_v1 = vpop.f32.mrf.mxu1 }
 0x50d   :  { %v1252_v2 = vadd.f32 %v1377_v11, %v1251_v1 }
 0x50e   :  { %v1518_v3 = vpop.f32.mrf.mxu1 }
 0x50f   :  { %1257 = vst [vmem:[%s2177_s15] sm:$0xff] %v1252_v2 }
 0x510   :  { %v1254_v41 = vpop.f32.mrf.mxu1 }
 0x512   :  { %v1519_v4 = vpop.f32.mrf.mxu1 }

</bundles_post_ra>
